<compile_context>
chip_gen: v6e
topology: v6e:2x2x1
jax: 0.10.0
libtpu: 0.0.40
codegen_flags: <defaults>
</compile_context>

<pallas_src>
import jax
import jax.numpy as jnp
from jax.experimental import pallas as pl
from jax.experimental.pallas import tpu as pltpu

INPUT_SIZE = 2       # problemDim
HIDDEN_SIZE = 64
NUM_LAYERS = 2
NUM_CLASSES = 1      # fc path below assumes 1 (VPU multiply + lane reduce)


# ---------------------------------------------------------------------------
# One-time wrapper-side weight layout (call once per parameter set, outside the
# per-inference jit).  Merged-gate column order: [i0 i1 f0 f1 o0 o1 g0 g1],
# each block H lanes wide; "0"/"1" = LSTM layer, PyTorch gate order is (i,f,g,o).
# ---------------------------------------------------------------------------
def prepare_params(params):
    (w_ih0, w_hh0, b0, w_ih1, w_hh1, b1, fc_w, fc_b) = params
    H = HIDDEN_SIZE
    I = w_ih0.shape[0]

    def gates(w):  # (K, 4H) torch order (i, f, g, o) -> (i, f, o, g)
        wi, wf, wg, wo = jnp.split(w, 4, axis=1)
        return wi, wf, wo, wg

    i0, f0, o0, g0 = gates(w_hh0)          # recurrent, layer 0   (H, H) each
    i1x, f1x, o1x, g1x = gates(w_ih1)      # input (=h0), layer 1 (H, H) each
    i1h, f1h, o1h, g1h = gates(w_hh1)      # recurrent, layer 1   (H, H) each
    zhh = jnp.zeros((H, H), jnp.float32)
    top = jnp.concatenate([i0, i1x, f0, f1x, o0, o1x, g0, g1x], axis=1)   # rows: h0
    bot = jnp.concatenate([zhh, i1h, zhh, f1h, zhh, o1h, zhh, g1h], axis=1)  # rows: h1
    w_big = jnp.concatenate([top, bot], axis=0)                           # (2H, 8H)

    xi, xf, xo, xg = gates(w_ih0)                                         # (I, H) each
    zih = jnp.zeros((I, H), jnp.float32)
    w0 = jnp.concatenate([xi, zih, xf, zih, xo, zih, xg, zih], axis=1)    # (I, 8H)

    bi0, bf0, bo0, bg0 = gates(b0)
    bi1, bf1, bo1, bg1 = gates(b1)
    b_all = jnp.concatenate([bi0, bi1, bf0, bf1, bo0, bo1, bg0, bg1], axis=1)  # (1, 8H)

    # fc (NUM_CLASSES == 1): weights live on the h1 lanes [H, 2H); h0 lanes are zero.
    fcw = jnp.zeros((1, 2 * H), jnp.float32).at[0, H:].set(fc_w[:, 0])    # (1, 2H)
    fcb = fc_b.reshape(1, NUM_CLASSES)                                    # (1, 1)
    return (w0, b_all, w_big, fcw, fcb)


# ---------------------------------------------------------------------------
# Pallas kernel + wrapper
# ---------------------------------------------------------------------------
def lstm_classifier(x, prepped):
    """x: [B, T, I] float32 (batch_first). Returns [B, NUM_CLASSES]."""
    B, T, I = x.shape
    H = HIDDEN_SIZE
    H2 = 2 * H                     # concatenated [h0 | h1] state width
    GG = 8 * H                     # merged gate width (both layers, 8 blocks of H)
    BP = ((B + 7) // 8) * 8        # batch padded to the 8-sublane group
    C = NUM_CLASSES
    (w0, b_all, w_big_w, fcw, fcb) = prepped

    # (B, T, I) -> zero-padded (T, BP, I) -> (T*BP, I); pad rows never touch real rows.
    xt = jnp.transpose(x, (1, 0, 2))
    x_pad = jnp.zeros((T, BP, I), jnp.float32).at[:, :B, :].set(xt).reshape(T * BP, I)

    def kernel(x_ref, w0_ref, ball_ref, wbig_ref, fcw_ref, fcb_ref, out_ref, xpb_ref):
        # ---- prologue: hoisted x-projection (+ all biases) for every timestep ----
        # K = I (=2) is far too small for the MXU: two VPU broadcast-FMAs per vreg.
        # Layer-0 blocks get x.W_ih0 + b0; layer-1 blocks carry b1 (constant over t).
        xall = x_ref[...]                                        # (T*BP, I)
        acc = jnp.broadcast_to(ball_ref[...], (T * BP, GG))
        for ii in range(I):                                      # static tiny loop
            acc = acc + xall[:, ii:ii + 1] * w0_ref[ii:ii + 1, :]
        xpb_ref[...] = acc.reshape(T, BP, GG)                    # (T, BP, GG) aligned slab

        w_big = wbig_ref[...]                                    # (2H, GG), hoisted load

        def merged_step(hcat, ccat, xpb_t):
            # Wavefront: one MXU call = layer-0 gates @ time t AND layer-1 gates @ t-1.
            gg = jnp.dot(hcat, w_big, preferred_element_type=jnp.float32) + xpb_t
            sig = jax.nn.sigmoid(gg[:, :6 * H])     # [i0 i1 f0 f1 o0 o1], 3 aligned groups
            gth = jnp.tanh(gg[:, 6 * H:])           # [g0 g1], 1 aligned group
            c_new = sig[:, H2:2 * H2] * ccat + sig[:, :H2] * gth   # f*c + i*g
            h_new = sig[:, 2 * H2:3 * H2] * jnp.tanh(c_new)        # o*tanh(c)
            return h_new, c_new

        # t = 0: layer-0 only (zero initial state => the recurrent matmul vanishes).
        g_first = xpb_ref[0]
        sig = jax.nn.sigmoid(g_first[:, :6 * H])
        gth = jnp.tanh(g_first[:, 6 * H:])
        c_first = sig[:, :H2] * gth
        h_first = sig[:, 2 * H2:3 * H2] * jnp.tanh(c_first)
        zeros_h = jnp.zeros((BP, H), jnp.float32)
        hcat = jnp.concatenate([h_first[:, :H], zeros_h], axis=1)   # [h0_0 | h1_{-1}=0]
        ccat = jnp.concatenate([c_first[:, :H], zeros_h], axis=1)   # [c0_0 | c1_{-1}=0]

        # t = 1 .. T-1: skewed recurrence, one merged matmul per step.
        def body(t, carry):
            h, c = carry
            return merged_step(h, c, xpb_ref[t])                    # aligned leading-index load

        hcat, ccat = jax.lax.fori_loop(1, T, body, (hcat, ccat), unroll=True)

        # epilogue: final layer-1 update (time T-1).  Layer-1 columns of every xpb slab
        # equal b1, so reusing slab T-1 is exact; its layer-0 output columns are unused
        # (and fcw is zero on those lanes).
        hcat, _ = merged_step(hcat, ccat, xpb_ref[T - 1])

        # fc with NUM_CLASSES == 1: VPU multiply + lane reduction (no N=1 MXU pass).
        out_ref[...] = (jnp.sum(hcat * fcw_ref[...], axis=-1, keepdims=True)
                        + fcb_ref[...])

    vmem = pl.BlockSpec(memory_space=pltpu.MemorySpace.VMEM)
    out = pl.pallas_call(
        kernel,
        out_shape=jax.ShapeDtypeStruct((BP, C), jnp.float32),
        in_specs=[vmem] * 6,
        out_specs=vmem,
        scratch_shapes=[pltpu.VMEM((T, BP, GG), jnp.float32)],   # hoisted x-projection slab
    )(x_pad, w0, b_all, w_big_w, fcw, fcb)
    return out[:B]


# ---------------------------------------------------------------------------
# Params + pure-JAX reference
# ---------------------------------------------------------------------------
def init_params(key):
    """Deterministic init mimicking PyTorch's U(-1/sqrt(H), 1/sqrt(H))."""
    H, I, C = HIDDEN_SIZE, INPUT_SIZE, NUM_CLASSES
    k = 1.0 / jnp.sqrt(jnp.float32(H))
    keys = jax.random.split(key, 12)
    u = lambda kk, shp: jax.random.uniform(kk, shp, jnp.float32, -k, k)

    # layer 0
    w_ih0 = u(keys[0], (I, 4 * H))
    w_hh0 = u(keys[1], (H, 4 * H))
    b0 = (u(keys[2], (1, 4 * H)) + u(keys[3], (1, 4 * H)))   # b_ih + b_hh
    # layer 1
    w_ih1 = u(keys[4], (H, 4 * H))
    w_hh1 = u(keys[5], (H, 4 * H))
    b1 = (u(keys[6], (1, 4 * H)) + u(keys[7], (1, 4 * H)))
    # fc
    fc_w = jax.random.uniform(keys[8], (H, C), jnp.float32, -k, k)
    fc_b = jax.random.uniform(keys[9], (1, C), jnp.float32, -k, k)
    return (w_ih0, w_hh0, b0, w_ih1, w_hh1, b1, fc_w, fc_b)


def reference(x, params):
    """Pure-JAX reference of the same forward pass (PyTorch gate order i,f,g,o)."""
    (w_ih0, w_hh0, b0, w_ih1, w_hh1, b1, fc_w, fc_b) = params
    B, T, I = x.shape
    H = HIDDEN_SIZE

    def cell(inp, h, c, wi, wh, b):
        g = inp @ wi + h @ wh + b
        i_g = jax.nn.sigmoid(g[:, 0 * H:1 * H])
        f_g = jax.nn.sigmoid(g[:, 1 * H:2 * H])
        g_g = jnp.tanh(g[:, 2 * H:3 * H])
        o_g = jax.nn.sigmoid(g[:, 3 * H:4 * H])
        c_new = f_g * c + i_g * g_g
        return o_g * jnp.tanh(c_new), c_new

    def step(carry, x_t):
        h0, c0, h1, c1 = carry
        h0, c0 = cell(x_t, h0, c0, w_ih0, w_hh0, b0)
        h1, c1 = cell(h0, h1, c1, w_ih1, w_hh1, b1)
        return (h0, c0, h1, c1), None

    init = tuple(jnp.zeros((B, H), jnp.float32) for _ in range(4))
    (h0, c0, h1, c1), _ = jax.lax.scan(step, init, jnp.transpose(x, (1, 0, 2)))
    return h1 @ fc_w + fc_b


if __name__ == "__main__":
    key = jax.random.PRNGKey(0)
    k_x, k_p = jax.random.split(key)

    B, T = 2, 8
    x = jax.random.normal(k_x, (B, T, INPUT_SIZE), jnp.float32)
    params = init_params(k_p)

    prepped = prepare_params(params)          # one-time layout prep (outside inference jit)
    logits = jax.jit(lstm_classifier)(x, prepped)
    jax.block_until_ready(logits)

    ref = reference(x, params)
    assert logits.shape == (B, NUM_CLASSES)
    assert jnp.allclose(logits, ref, atol=1e-4, rtol=1e-4)
    print("KERNEL_OK")
</pallas_src>

<mosaic_0001>
module attributes {stable_mosaic.version = 11 : i64} {
  func.func @kernel(%arg0: memref<64x2xf32, #tpu.memory_space<vmem>>, %arg1: memref<2x512xf32, #tpu.memory_space<vmem>>, %arg2: memref<1x512xf32, #tpu.memory_space<vmem>>, %arg3: memref<128x512xf32, #tpu.memory_space<vmem>>, %arg4: memref<1x128xf32, #tpu.memory_space<vmem>>, %arg5: memref<1x1xf32, #tpu.memory_space<vmem>>, %arg6: memref<8x1xf32, #tpu.memory_space<vmem>>, %arg7: memref<8x8x512xf32, #tpu.memory_space<vmem>>) attributes {dimension_semantics = [], scalar_prefetch = 0 : i64, scratch_operands = 1 : i64, tpu.core_type = #tpu.core_type<tc>} {
    %c0 = arith.constant 0 : index
    %c0_0 = arith.constant 0 : index
    %0 = vector.load %arg0[%c0, %c0_0] : memref<64x2xf32, #tpu.memory_space<vmem>>, vector<64x2xf32>
    %c0_1 = arith.constant 0 : index
    %c0_2 = arith.constant 0 : index
    %1 = vector.load %arg2[%c0_1, %c0_2] : memref<1x512xf32, #tpu.memory_space<vmem>>, vector<1x512xf32>
    %2 = vector.shape_cast %1 : vector<1x512xf32> to vector<1x512xf32>
    %3 = vector.broadcast %2 : vector<1x512xf32> to vector<64x512xf32>
    %4 = vector.extract_strided_slice %0 {offsets = [0, 0], sizes = [64, 1], strides = [1, 1]} : vector<64x2xf32> to vector<64x1xf32>
    %c0_3 = arith.constant 0 : index
    %c0_4 = arith.constant 0 : index
    %5 = vector.load %arg1[%c0_3, %c0_4] : memref<2x512xf32, #tpu.memory_space<vmem>>, vector<1x512xf32>
    %6 = vector.broadcast %4 : vector<64x1xf32> to vector<64x512xf32>
    %7 = vector.broadcast %5 : vector<1x512xf32> to vector<64x512xf32>
    %8 = arith.mulf %6, %7 : vector<64x512xf32>
    %9 = arith.addf %3, %8 : vector<64x512xf32>
    %10 = vector.extract_strided_slice %0 {offsets = [0, 1], sizes = [64, 1], strides = [1, 1]} : vector<64x2xf32> to vector<64x1xf32>
    %c1 = arith.constant 1 : index
    %c0_5 = arith.constant 0 : index
    %11 = vector.load %arg1[%c1, %c0_5] : memref<2x512xf32, #tpu.memory_space<vmem>>, vector<1x512xf32>
    %12 = vector.broadcast %10 : vector<64x1xf32> to vector<64x512xf32>
    %13 = vector.broadcast %11 : vector<1x512xf32> to vector<64x512xf32>
    %14 = arith.mulf %12, %13 : vector<64x512xf32>
    %15 = arith.addf %9, %14 : vector<64x512xf32>
    %16 = vector.shape_cast %15 : vector<64x512xf32> to vector<8x8x512xf32>
    %c0_6 = arith.constant 0 : index
    %c0_7 = arith.constant 0 : index
    %c0_8 = arith.constant 0 : index
    %17 = vector.load %arg7[%c0_6, %c0_7, %c0_8] : memref<8x8x512xf32, #tpu.memory_space<vmem>>, vector<8x8x512xf32>
    tpu.vector_store %arg7[%c0_6, %c0_7, %c0_8], %16 {strides = array<i32>} : memref<8x8x512xf32, #tpu.memory_space<vmem>>, vector<8x8x512xf32>,
    %c0_9 = arith.constant 0 : index
    %c0_10 = arith.constant 0 : index
    %18 = vector.load %arg3[%c0_9, %c0_10] : memref<128x512xf32, #tpu.memory_space<vmem>>, vector<128x512xf32>
    %c0_11 = arith.constant 0 : index
    %c0_12 = arith.constant 0 : index
    %c0_13 = arith.constant 0 : index
    %19 = vector.load %arg7[%c0_11, %c0_12, %c0_13] : memref<8x8x512xf32, #tpu.memory_space<vmem>>, vector<1x8x512xf32>
    %20 = vector.shape_cast %19 : vector<1x8x512xf32> to vector<8x512xf32>
    %21 = vector.extract_strided_slice %20 {offsets = [0, 0], sizes = [8, 384], strides = [1, 1]} : vector<8x512xf32> to vector<8x384xf32>
    %22 = arith.negf %21 : vector<8x384xf32>
    %23 = math.exp %22 : vector<8x384xf32>
    %cst = arith.constant 1.000000e+00 : f32
    %24 = vector.broadcast %cst : f32 to vector<8x384xf32>
    %25 = arith.addf %24, %23 : vector<8x384xf32>
    %26 = arith.divf %24, %25 : vector<8x384xf32>
    %27 = vector.extract_strided_slice %20 {offsets = [0, 384], sizes = [8, 128], strides = [1, 1]} : vector<8x512xf32> to vector<8x128xf32>
    %28 = math.tanh %27 : vector<8x128xf32>
    %29 = vector.extract_strided_slice %26 {offsets = [0, 0], sizes = [8, 128], strides = [1, 1]} : vector<8x384xf32> to vector<8x128xf32>
    %30 = arith.mulf %29, %28 : vector<8x128xf32>
    %31 = vector.extract_strided_slice %26 {offsets = [0, 256], sizes = [8, 128], strides = [1, 1]} : vector<8x384xf32> to vector<8x128xf32>
    %32 = math.tanh %30 : vector<8x128xf32>
    %33 = arith.mulf %31, %32 : vector<8x128xf32>
    %cst_14 = arith.constant 0.000000e+00 : f32
    %34 = vector.broadcast %cst_14 : f32 to vector<8x64xf32>
    %35 = vector.extract_strided_slice %33 {offsets = [0, 0], sizes = [8, 64], strides = [1, 1]} : vector<8x128xf32> to vector<8x64xf32>
    %36 = tpu.concatenate %35, %34 in 1 : vector<8x64xf32>, vector<8x64xf32> -> vector<8x128xf32>
    %37 = vector.extract_strided_slice %30 {offsets = [0, 0], sizes = [8, 64], strides = [1, 1]} : vector<8x128xf32> to vector<8x64xf32>
    %38 = tpu.concatenate %37, %34 in 1 : vector<8x64xf32>, vector<8x64xf32> -> vector<8x128xf32>
    %c1_i32 = arith.constant 1 : i32
    %39 = arith.index_cast %c1_i32 : i32 to index
    %c0_15 = arith.constant 0 : index
    %c0_16 = arith.constant 0 : index
    %40 = vector.load %arg7[%39, %c0_15, %c0_16] : memref<8x8x512xf32, #tpu.memory_space<vmem>>, vector<1x8x512xf32>
    %41 = vector.shape_cast %40 : vector<1x8x512xf32> to vector<8x512xf32>
    %cst_17 = arith.constant dense<0.000000e+00> : vector<8x512xf32>
    %42 = tpu.matmul %36, %18, %cst_17 {dimension_numbers = #tpu.dot_dimension_numbers<[1], [0], [0], [1], [0, 0, 1, 1], [], []>} : vector<8x128xf32>, vector<128x512xf32>, vector<8x512xf32> -> vector<8x512xf32>
    %43 = arith.addf %42, %41 : vector<8x512xf32>
    %44 = vector.extract_strided_slice %43 {offsets = [0, 0], sizes = [8, 384], strides = [1, 1]} : vector<8x512xf32> to vector<8x384xf32>
    %45 = arith.negf %44 : vector<8x384xf32>
    %46 = math.exp %45 : vector<8x384xf32>
    %cst_18 = arith.constant 1.000000e+00 : f32
    %47 = vector.broadcast %cst_18 : f32 to vector<8x384xf32>
    %48 = arith.addf %47, %46 : vector<8x384xf32>
    %49 = arith.divf %47, %48 : vector<8x384xf32>
    %50 = vector.extract_strided_slice %43 {offsets = [0, 384], sizes = [8, 128], strides = [1, 1]} : vector<8x512xf32> to vector<8x128xf32>
    %51 = math.tanh %50 : vector<8x128xf32>
    %52 = vector.extract_strided_slice %49 {offsets = [0, 128], sizes = [8, 128], strides = [1, 1]} : vector<8x384xf32> to vector<8x128xf32>
    %53 = arith.mulf %52, %38 : vector<8x128xf32>
    %54 = vector.extract_strided_slice %49 {offsets = [0, 0], sizes = [8, 128], strides = [1, 1]} : vector<8x384xf32> to vector<8x128xf32>
    %55 = arith.mulf %54, %51 : vector<8x128xf32>
    %56 = arith.addf %53, %55 : vector<8x128xf32>
    %57 = vector.extract_strided_slice %49 {offsets = [0, 256], sizes = [8, 128], strides = [1, 1]} : vector<8x384xf32> to vector<8x128xf32>
    %58 = math.tanh %56 : vector<8x128xf32>
    %59 = arith.mulf %57, %58 : vector<8x128xf32>
    %c2_i32 = arith.constant 2 : i32
    %60 = arith.index_cast %c2_i32 : i32 to index
    %c0_19 = arith.constant 0 : index
    %c0_20 = arith.constant 0 : index
    %61 = vector.load %arg7[%60, %c0_19, %c0_20] : memref<8x8x512xf32, #tpu.memory_space<vmem>>, vector<1x8x512xf32>
    %62 = vector.shape_cast %61 : vector<1x8x512xf32> to vector<8x512xf32>
    %cst_21 = arith.constant dense<0.000000e+00> : vector<8x512xf32>
    %63 = tpu.matmul %59, %18, %cst_21 {dimension_numbers = #tpu.dot_dimension_numbers<[1], [0], [0], [1], [0, 0, 1, 1], [], []>} : vector<8x128xf32>, vector<128x512xf32>, vector<8x512xf32> -> vector<8x512xf32>
    %64 = arith.addf %63, %62 : vector<8x512xf32>
    %65 = vector.extract_strided_slice %64 {offsets = [0, 0], sizes = [8, 384], strides = [1, 1]} : vector<8x512xf32> to vector<8x384xf32>
    %66 = arith.negf %65 : vector<8x384xf32>
    %67 = math.exp %66 : vector<8x384xf32>
    %cst_22 = arith.constant 1.000000e+00 : f32
    %68 = vector.broadcast %cst_22 : f32 to vector<8x384xf32>
    %69 = arith.addf %68, %67 : vector<8x384xf32>
    %70 = arith.divf %68, %69 : vector<8x384xf32>
    %71 = vector.extract_strided_slice %64 {offsets = [0, 384], sizes = [8, 128], strides = [1, 1]} : vector<8x512xf32> to vector<8x128xf32>
    %72 = math.tanh %71 : vector<8x128xf32>
    %73 = vector.extract_strided_slice %70 {offsets = [0, 128], sizes = [8, 128], strides = [1, 1]} : vector<8x384xf32> to vector<8x128xf32>
    %74 = arith.mulf %73, %56 : vector<8x128xf32>
    %75 = vector.extract_strided_slice %70 {offsets = [0, 0], sizes = [8, 128], strides = [1, 1]} : vector<8x384xf32> to vector<8x128xf32>
    %76 = arith.mulf %75, %72 : vector<8x128xf32>
    %77 = arith.addf %74, %76 : vector<8x128xf32>
    %78 = vector.extract_strided_slice %70 {offsets = [0, 256], sizes = [8, 128], strides = [1, 1]} : vector<8x384xf32> to vector<8x128xf32>
    %79 = math.tanh %77 : vector<8x128xf32>
    %80 = arith.mulf %78, %79 : vector<8x128xf32>
    %c3_i32 = arith.constant 3 : i32
    %81 = arith.index_cast %c3_i32 : i32 to index
    %c0_23 = arith.constant 0 : index
    %c0_24 = arith.constant 0 : index
    %82 = vector.load %arg7[%81, %c0_23, %c0_24] : memref<8x8x512xf32, #tpu.memory_space<vmem>>, vector<1x8x512xf32>
    %83 = vector.shape_cast %82 : vector<1x8x512xf32> to vector<8x512xf32>
    %cst_25 = arith.constant dense<0.000000e+00> : vector<8x512xf32>
    %84 = tpu.matmul %80, %18, %cst_25 {dimension_numbers = #tpu.dot_dimension_numbers<[1], [0], [0], [1], [0, 0, 1, 1], [], []>} : vector<8x128xf32>, vector<128x512xf32>, vector<8x512xf32> -> vector<8x512xf32>
    %85 = arith.addf %84, %83 : vector<8x512xf32>
    %86 = vector.extract_strided_slice %85 {offsets = [0, 0], sizes = [8, 384], strides = [1, 1]} : vector<8x512xf32> to vector<8x384xf32>
    %87 = arith.negf %86 : vector<8x384xf32>
    %88 = math.exp %87 : vector<8x384xf32>
    %cst_26 = arith.constant 1.000000e+00 : f32
    %89 = vector.broadcast %cst_26 : f32 to vector<8x384xf32>
    %90 = arith.addf %89, %88 : vector<8x384xf32>
    %91 = arith.divf %89, %90 : vector<8x384xf32>
    %92 = vector.extract_strided_slice %85 {offsets = [0, 384], sizes = [8, 128], strides = [1, 1]} : vector<8x512xf32> to vector<8x128xf32>
    %93 = math.tanh %92 : vector<8x128xf32>
    %94 = vector.extract_strided_slice %91 {offsets = [0, 128], sizes = [8, 128], strides = [1, 1]} : vector<8x384xf32> to vector<8x128xf32>
    %95 = arith.mulf %94, %77 : vector<8x128xf32>
    %96 = vector.extract_strided_slice %91 {offsets = [0, 0], sizes = [8, 128], strides = [1, 1]} : vector<8x384xf32> to vector<8x128xf32>
    %97 = arith.mulf %96, %93 : vector<8x128xf32>
    %98 = arith.addf %95, %97 : vector<8x128xf32>
    %99 = vector.extract_strided_slice %91 {offsets = [0, 256], sizes = [8, 128], strides = [1, 1]} : vector<8x384xf32> to vector<8x128xf32>
    %100 = math.tanh %98 : vector<8x128xf32>
    %101 = arith.mulf %99, %100 : vector<8x128xf32>
    %c4_i32 = arith.constant 4 : i32
    %102 = arith.index_cast %c4_i32 : i32 to index
    %c0_27 = arith.constant 0 : index
    %c0_28 = arith.constant 0 : index
    %103 = vector.load %arg7[%102, %c0_27, %c0_28] : memref<8x8x512xf32, #tpu.memory_space<vmem>>, vector<1x8x512xf32>
    %104 = vector.shape_cast %103 : vector<1x8x512xf32> to vector<8x512xf32>
    %cst_29 = arith.constant dense<0.000000e+00> : vector<8x512xf32>
    %105 = tpu.matmul %101, %18, %cst_29 {dimension_numbers = #tpu.dot_dimension_numbers<[1], [0], [0], [1], [0, 0, 1, 1], [], []>} : vector<8x128xf32>, vector<128x512xf32>, vector<8x512xf32> -> vector<8x512xf32>
    %106 = arith.addf %105, %104 : vector<8x512xf32>
    %107 = vector.extract_strided_slice %106 {offsets = [0, 0], sizes = [8, 384], strides = [1, 1]} : vector<8x512xf32> to vector<8x384xf32>
    %108 = arith.negf %107 : vector<8x384xf32>
    %109 = math.exp %108 : vector<8x384xf32>
    %cst_30 = arith.constant 1.000000e+00 : f32
    %110 = vector.broadcast %cst_30 : f32 to vector<8x384xf32>
    %111 = arith.addf %110, %109 : vector<8x384xf32>
    %112 = arith.divf %110, %111 : vector<8x384xf32>
    %113 = vector.extract_strided_slice %106 {offsets = [0, 384], sizes = [8, 128], strides = [1, 1]} : vector<8x512xf32> to vector<8x128xf32>
    %114 = math.tanh %113 : vector<8x128xf32>
    %115 = vector.extract_strided_slice %112 {offsets = [0, 128], sizes = [8, 128], strides = [1, 1]} : vector<8x384xf32> to vector<8x128xf32>
    %116 = arith.mulf %115, %98 : vector<8x128xf32>
    %117 = vector.extract_strided_slice %112 {offsets = [0, 0], sizes = [8, 128], strides = [1, 1]} : vector<8x384xf32> to vector<8x128xf32>
    %118 = arith.mulf %117, %114 : vector<8x128xf32>
    %119 = arith.addf %116, %118 : vector<8x128xf32>
    %120 = vector.extract_strided_slice %112 {offsets = [0, 256], sizes = [8, 128], strides = [1, 1]} : vector<8x384xf32> to vector<8x128xf32>
    %121 = math.tanh %119 : vector<8x128xf32>
    %122 = arith.mulf %120, %121 : vector<8x128xf32>
    %c5_i32 = arith.constant 5 : i32
    %123 = arith.index_cast %c5_i32 : i32 to index
    %c0_31 = arith.constant 0 : index
    %c0_32 = arith.constant 0 : index
    %124 = vector.load %arg7[%123, %c0_31, %c0_32] : memref<8x8x512xf32, #tpu.memory_space<vmem>>, vector<1x8x512xf32>
    %125 = vector.shape_cast %124 : vector<1x8x512xf32> to vector<8x512xf32>
    %cst_33 = arith.constant dense<0.000000e+00> : vector<8x512xf32>
    %126 = tpu.matmul %122, %18, %cst_33 {dimension_numbers = #tpu.dot_dimension_numbers<[1], [0], [0], [1], [0, 0, 1, 1], [], []>} : vector<8x128xf32>, vector<128x512xf32>, vector<8x512xf32> -> vector<8x512xf32>
    %127 = arith.addf %126, %125 : vector<8x512xf32>
    %128 = vector.extract_strided_slice %127 {offsets = [0, 0], sizes = [8, 384], strides = [1, 1]} : vector<8x512xf32> to vector<8x384xf32>
    %129 = arith.negf %128 : vector<8x384xf32>
    %130 = math.exp %129 : vector<8x384xf32>
    %cst_34 = arith.constant 1.000000e+00 : f32
    %131 = vector.broadcast %cst_34 : f32 to vector<8x384xf32>
    %132 = arith.addf %131, %130 : vector<8x384xf32>
    %133 = arith.divf %131, %132 : vector<8x384xf32>
    %134 = vector.extract_strided_slice %127 {offsets = [0, 384], sizes = [8, 128], strides = [1, 1]} : vector<8x512xf32> to vector<8x128xf32>
    %135 = math.tanh %134 : vector<8x128xf32>
    %136 = vector.extract_strided_slice %133 {offsets = [0, 128], sizes = [8, 128], strides = [1, 1]} : vector<8x384xf32> to vector<8x128xf32>
    %137 = arith.mulf %136, %119 : vector<8x128xf32>
    %138 = vector.extract_strided_slice %133 {offsets = [0, 0], sizes = [8, 128], strides = [1, 1]} : vector<8x384xf32> to vector<8x128xf32>
    %139 = arith.mulf %138, %135 : vector<8x128xf32>
    %140 = arith.addf %137, %139 : vector<8x128xf32>
    %141 = vector.extract_strided_slice %133 {offsets = [0, 256], sizes = [8, 128], strides = [1, 1]} : vector<8x384xf32> to vector<8x128xf32>
    %142 = math.tanh %140 : vector<8x128xf32>
    %143 = arith.mulf %141, %142 : vector<8x128xf32>
    %c6_i32 = arith.constant 6 : i32
    %144 = arith.index_cast %c6_i32 : i32 to index
    %c0_35 = arith.constant 0 : index
    %c0_36 = arith.constant 0 : index
    %145 = vector.load %arg7[%144, %c0_35, %c0_36] : memref<8x8x512xf32, #tpu.memory_space<vmem>>, vector<1x8x512xf32>
    %146 = vector.shape_cast %145 : vector<1x8x512xf32> to vector<8x512xf32>
    %cst_37 = arith.constant dense<0.000000e+00> : vector<8x512xf32>
    %147 = tpu.matmul %143, %18, %cst_37 {dimension_numbers = #tpu.dot_dimension_numbers<[1], [0], [0], [1], [0, 0, 1, 1], [], []>} : vector<8x128xf32>, vector<128x512xf32>, vector<8x512xf32> -> vector<8x512xf32>
    %148 = arith.addf %147, %146 : vector<8x512xf32>
    %149 = vector.extract_strided_slice %148 {offsets = [0, 0], sizes = [8, 384], strides = [1, 1]} : vector<8x512xf32> to vector<8x384xf32>
    %150 = arith.negf %149 : vector<8x384xf32>
    %151 = math.exp %150 : vector<8x384xf32>
    %cst_38 = arith.constant 1.000000e+00 : f32
    %152 = vector.broadcast %cst_38 : f32 to vector<8x384xf32>
    %153 = arith.addf %152, %151 : vector<8x384xf32>
    %154 = arith.divf %152, %153 : vector<8x384xf32>
    %155 = vector.extract_strided_slice %148 {offsets = [0, 384], sizes = [8, 128], strides = [1, 1]} : vector<8x512xf32> to vector<8x128xf32>
    %156 = math.tanh %155 : vector<8x128xf32>
    %157 = vector.extract_strided_slice %154 {offsets = [0, 128], sizes = [8, 128], strides = [1, 1]} : vector<8x384xf32> to vector<8x128xf32>
    %158 = arith.mulf %157, %140 : vector<8x128xf32>
    %159 = vector.extract_strided_slice %154 {offsets = [0, 0], sizes = [8, 128], strides = [1, 1]} : vector<8x384xf32> to vector<8x128xf32>
    %160 = arith.mulf %159, %156 : vector<8x128xf32>
    %161 = arith.addf %158, %160 : vector<8x128xf32>
    %162 = vector.extract_strided_slice %154 {offsets = [0, 256], sizes = [8, 128], strides = [1, 1]} : vector<8x384xf32> to vector<8x128xf32>
    %163 = math.tanh %161 : vector<8x128xf32>
    %164 = arith.mulf %162, %163 : vector<8x128xf32>
    %c7_i32 = arith.constant 7 : i32
    %165 = arith.index_cast %c7_i32 : i32 to index
    %c0_39 = arith.constant 0 : index
    %c0_40 = arith.constant 0 : index
    %166 = vector.load %arg7[%165, %c0_39, %c0_40] : memref<8x8x512xf32, #tpu.memory_space<vmem>>, vector<1x8x512xf32>
    %167 = vector.shape_cast %166 : vector<1x8x512xf32> to vector<8x512xf32>
    %cst_41 = arith.constant dense<0.000000e+00> : vector<8x512xf32>
    %168 = tpu.matmul %164, %18, %cst_41 {dimension_numbers = #tpu.dot_dimension_numbers<[1], [0], [0], [1], [0, 0, 1, 1], [], []>} : vector<8x128xf32>, vector<128x512xf32>, vector<8x512xf32> -> vector<8x512xf32>
    %169 = arith.addf %168, %167 : vector<8x512xf32>
    %170 = vector.extract_strided_slice %169 {offsets = [0, 0], sizes = [8, 384], strides = [1, 1]} : vector<8x512xf32> to vector<8x384xf32>
    %171 = arith.negf %170 : vector<8x384xf32>
    %172 = math.exp %171 : vector<8x384xf32>
    %cst_42 = arith.constant 1.000000e+00 : f32
    %173 = vector.broadcast %cst_42 : f32 to vector<8x384xf32>
    %174 = arith.addf %173, %172 : vector<8x384xf32>
    %175 = arith.divf %173, %174 : vector<8x384xf32>
    %176 = vector.extract_strided_slice %169 {offsets = [0, 384], sizes = [8, 128], strides = [1, 1]} : vector<8x512xf32> to vector<8x128xf32>
    %177 = math.tanh %176 : vector<8x128xf32>
    %178 = vector.extract_strided_slice %175 {offsets = [0, 128], sizes = [8, 128], strides = [1, 1]} : vector<8x384xf32> to vector<8x128xf32>
    %179 = arith.mulf %178, %161 : vector<8x128xf32>
    %180 = vector.extract_strided_slice %175 {offsets = [0, 0], sizes = [8, 128], strides = [1, 1]} : vector<8x384xf32> to vector<8x128xf32>
    %181 = arith.mulf %180, %177 : vector<8x128xf32>
    %182 = arith.addf %179, %181 : vector<8x128xf32>
    %183 = vector.extract_strided_slice %175 {offsets = [0, 256], sizes = [8, 128], strides = [1, 1]} : vector<8x384xf32> to vector<8x128xf32>
    %184 = math.tanh %182 : vector<8x128xf32>
    %185 = arith.mulf %183, %184 : vector<8x128xf32>
    %c7_i32_43 = arith.constant 7 : i32
    %c7 = arith.constant 7 : index
    %c0_44 = arith.constant 0 : index
    %c0_45 = arith.constant 0 : index
    %186 = vector.load %arg7[%c7, %c0_44, %c0_45] : memref<8x8x512xf32, #tpu.memory_space<vmem>>, vector<1x8x512xf32>
    %187 = vector.shape_cast %186 : vector<1x8x512xf32> to vector<8x512xf32>
    %cst_46 = arith.constant dense<0.000000e+00> : vector<8x512xf32>
    %188 = tpu.matmul %185, %18, %cst_46 {dimension_numbers = #tpu.dot_dimension_numbers<[1], [0], [0], [1], [0, 0, 1, 1], [], []>} : vector<8x128xf32>, vector<128x512xf32>, vector<8x512xf32> -> vector<8x512xf32>
    %189 = arith.addf %188, %187 : vector<8x512xf32>
    %190 = vector.extract_strided_slice %189 {offsets = [0, 0], sizes = [8, 384], strides = [1, 1]} : vector<8x512xf32> to vector<8x384xf32>
    %191 = arith.negf %190 : vector<8x384xf32>
    %192 = math.exp %191 : vector<8x384xf32>
    %cst_47 = arith.constant 1.000000e+00 : f32
    %193 = vector.broadcast %cst_47 : f32 to vector<8x384xf32>
    %194 = arith.addf %193, %192 : vector<8x384xf32>
    %195 = arith.divf %193, %194 : vector<8x384xf32>
    %196 = vector.extract_strided_slice %189 {offsets = [0, 384], sizes = [8, 128], strides = [1, 1]} : vector<8x512xf32> to vector<8x128xf32>
    %197 = math.tanh %196 : vector<8x128xf32>
    %198 = vector.extract_strided_slice %195 {offsets = [0, 128], sizes = [8, 128], strides = [1, 1]} : vector<8x384xf32> to vector<8x128xf32>
    %199 = arith.mulf %198, %182 : vector<8x128xf32>
    %200 = vector.extract_strided_slice %195 {offsets = [0, 0], sizes = [8, 128], strides = [1, 1]} : vector<8x384xf32> to vector<8x128xf32>
    %201 = arith.mulf %200, %197 : vector<8x128xf32>
    %202 = arith.addf %199, %201 : vector<8x128xf32>
    %203 = vector.extract_strided_slice %195 {offsets = [0, 256], sizes = [8, 128], strides = [1, 1]} : vector<8x384xf32> to vector<8x128xf32>
    %204 = math.tanh %202 : vector<8x128xf32>
    %205 = arith.mulf %203, %204 : vector<8x128xf32>
    %c0_48 = arith.constant 0 : index
    %c0_49 = arith.constant 0 : index
    %206 = vector.load %arg4[%c0_48, %c0_49] : memref<1x128xf32, #tpu.memory_space<vmem>>, vector<1x128xf32>
    %207 = vector.broadcast %206 : vector<1x128xf32> to vector<8x128xf32>
    %208 = arith.mulf %205, %207 : vector<8x128xf32>
    %cst_50 = arith.constant dense<0.000000e+00> : vector<8xf32>
    %209 = vector.multi_reduction <add>, %208, %cst_50 [1] : vector<8x128xf32> to vector<8xf32>
    %210 = vector.shape_cast %209 : vector<8xf32> to vector<8x1xf32>
    %c0_51 = arith.constant 0 : index
    %c0_52 = arith.constant 0 : index
    %211 = vector.load %arg5[%c0_51, %c0_52] : memref<1x1xf32, #tpu.memory_space<vmem>>, vector<1x1xf32>
    %212 = vector.broadcast %211 : vector<1x1xf32> to vector<8x1xf32>
    %213 = arith.addf %210, %212 : vector<8x1xf32>
    %c0_53 = arith.constant 0 : index
    %c0_54 = arith.constant 0 : index
    %214 = vector.load %arg6[%c0_53, %c0_54] : memref<8x1xf32, #tpu.memory_space<vmem>>, vector<8x1xf32>
    tpu.vector_store %arg6[%c0_53, %c0_54], %213 {strides = array<i32>} : memref<8x1xf32, #tpu.memory_space<vmem>>, vector<8x1xf32>,
    return
  }
}

</mosaic_0001>

<bundles_post_ra>
// kernel: lstm_classifier.1
= control target key start
LH: loop header
LB: loop body
LE: loop exit
PB: predicated region body
PF: predicated region fallthrough
CT: control target
= control target key end

     0   :  { %s3232_s0 = inlined_call_operand.vmem [shape: f32[64,2], index: 0, kind: input, shape index: {}]   ;;  %s3233_s1 = inlined_call_operand.vmem [shape: f32[2,512], index: 1, kind: input, shape index: {}]   ;;  %s3234_s2 = inlined_call_operand.vmem [shape: f32[1,512], index: 2, kind: input, shape index: {}]   ;;  %s3235_s3 = inlined_call_operand.hbm [shape: f32[128,512], index: 3, kind: input, shape index: {}]   ;;  %s3236_s4 = inlined_call_operand.vmem [shape: f32[1,128], index: 4, kind: input, shape index: {}]   ;;  %s3237_s5 = inlined_call_operand.<no memory space> [shape: f32[1,1], index: 5, kind: input, shape index: {}]   ;;  %s3238_s6 = inlined_call_operand.vmem [shape: f32[8,1], index: 6, kind: output, shape index: {}]  }
   0x1   :  { %v11_v0 = vstv %s3237_s5 }
   0x2   :  { %12 = vst [vmem:[#allocation3] sm:$0x1] %v11_v0 }
   0x3   :  { %13 = vsyncpa [#allocation5], 0  ;;  %s2088_s23 = smov [#allocation4]  }
   0x4   :  { %s25_s24 = sshll.u32 %s2088_s23, 4  ;;  %s26_s24 = int_to_ptr.vmem [resolvable:$true] %s25_s24 }
   0x5   :  { %s2074_s25 = scalar_lea.vmem %s26_s24, 8192  ;;  %p2079_p1 = scmp.lt.s32.totalorder %s26_s24, %s26_s24 }
   0x6   :  { %p2075_p0 = scmp.ne.s32.totalorder %s26_s24, %s2074_s25  ;;  %p2080_p2 = scmp.lt.s32.totalorder %s2074_s25, %s2074_s25 }
   0x8   :  { %p2081_p3 = por %p2080_p2, %p2079_p1 }
   0xa   :  { %p2082_p4 = pnand %p2081_p3, %p2075_p0 }
   0xc   :  { %2085 = shalt.err (!%p2082_p4)
}
   0xd   :  { %s2089_s26 = smov 512   ;;  %s2090_s27 = smov 32  }
   0xe   :  { %31 = dma.hbm_to_vmem [thread:$0]  %s3235_s3, 8192, %s26_s24, [#allocation5], %s2089_s26, %s2089_s26, %s2090_s27  }
   0xf   :  { %2086 = dma.done.wait [#allocation5], 8192  }
  0x10   :  { %2087 = vsyncadd [#allocation5], 4294959104  ;;  %v2091_v1 = vmov 0   ;;  %v49_v2 = vlaneseq  ;;  %v40_v4 = vld [vmem:[%s3232_s0 + $0x8] sm:$0xff]  ;;  %v39_v5 = vld [vmem:[%s3232_s0] sm:$0xff]  ;;  %v2092_v9 = vmov 1  }
  0x11   :  { %1859 = vset.pattern.permute.xlu1 %v2091_v1  ;;  %1857 = vset.pattern.permute.xlu0 %v2091_v1  ;;  %v2147_v7 = vld [vmem:[%s3233_s1] ss:$2 sm:$0xf]  ;;  %v2155_v10 = vld [vmem:[%s3233_s1 + $0x1] ss:$2 sm:$0xf] }
  0x12   :  { %v2135_v3 = vshrl.u32 %v49_v2, 7  ;;  %77 = vperm.xlu1 %1859, %v40_v4   ;;  %72 = vperm.xlu0 %1857, %v39_v5   ;;  %v41_v12 = vld [vmem:[%s3232_s0 + $0x10] sm:$0xff]  ;;  %v2166_v13 = vld [vmem:[%s3234_s2] sm:$0xf]  ;;  %v42_v15 = vld [vmem:[%s3232_s0 + $0x18] sm:$0xff]  ;;  %vm429_vm0 = vcmask 523264  }
  0x13   :  { %v43_v16 = vld [vmem:[%s3232_s0 + $0x20] sm:$0xff]  ;;  %v44_v17 = vld [vmem:[%s3232_s0 + $0x28] sm:$0xff]  ;;  %v45_v18 = vld [vmem:[%s3232_s0 + $0x30] sm:$0xff]  ;;  %vm1813_vm1 = vcmask 7168  }
  0x14   :  { %v55_v6 = vsub.s32 1, %v2135_v3  ;;  %v2183_v19 = vld [vmem:[#allocation4 + $0x1e8] sm:$0xff]  ;;  %v2185_v20 = vld [vmem:[#allocation4 + $0x1f8] sm:$0xff]  ;;  %v2189_v21 = vld [vmem:[#allocation4 + $0x1e0] sm:$0xff] }
  0x15   :  { %3397 = vst [vmem:[#allocation10_spill] sm:$0xff] %v2183_v19  ;;  %3398 = vst [vmem:[#allocation11_spill] sm:$0xff] %v2185_v20  ;;  %437 = vmatprep.subr.mxu0 %v2183_v19  ;;  %508 = vmatprep.subr.mxu1 %v2185_v20  ;;  %v2191_v22 = vld [vmem:[#allocation4 + $0x1f0] sm:$0xff]  ;;  %v2197_v24 = vld [vmem:[#allocation4 + $0x1c8] sm:$0xff] }
  0x16   :  { %v2150_v8 = vrot.slane %v2147_v7, %v55_v6  ;;  %1860 = vset.pattern.permute.xlu1 %v2092_v9  ;;  %1858 = vset.pattern.permute.xlu0 %v2092_v9  ;;  %v2158_v11 = vrot.slane %v2155_v10, %v55_v6  ;;  %v2169_v14 = vrot.slane %v2166_v13, %v55_v6  ;;  %v46_v23 = vld [vmem:[%s3232_s0 + $0x38] sm:$0xff]  ;;  %v2202_v26 = vld [vmem:[#allocation4 + $0x1c0] sm:$0xff]  ;;  %v2206_v28 = vld [vmem:[#allocation4 + $0x1a8] sm:$0xff] }
  0x17   :  { %202 = vperm.xlu1 %1860, %v40_v4   ;;  %198 = vperm.xlu0 %1858, %v39_v5   ;;  %v2199_v25 = vld [vmem:[#allocation4 + $0x1d8] sm:$0xff]  ;;  %v2204_v27 = vld [vmem:[#allocation4 + $0x1d0] sm:$0xff]  ;;  %v2214_v30 = vld [vmem:[#allocation4 + $0x1a0] sm:$0xff] }
  0x18   :  { %3394 = vst [vmem:[#allocation7_spill] sm:$0xff] %v2150_v8  ;;  %3395 = vst [vmem:[#allocation8_spill] sm:$0xff] %v2158_v11  ;;  %438 = vmatpush1.msra.mxu0 %v2189_v21  ;;  %509 = vmatpush1.msra.mxu1 %v2191_v22  ;;  %v2210_v29 = vld [vmem:[#allocation4 + $0x1b8] sm:$0xff]  ;;  %v2216_v31 = vld [vmem:[#allocation4 + $0x1b0] sm:$0xff] }
  0x19   :  { %3396 = vst [vmem:[#allocation9_spill] sm:$0xff] %v2169_v14  ;;  %439 = vmatprep.subr.mxu0 %v2197_v24  ;;  %510 = vmatprep.subr.mxu1 %v2199_v25  ;;  %v2219_v32 = vld [vmem:[#allocation4 + $0x188] sm:$0xff]  ;;  %v2221_v33 = vld [vmem:[#allocation4 + $0x198] sm:$0xff]  ;;  %v2224_v34 = vld [vmem:[#allocation4 + $0x180] sm:$0xff] }
  0x1a   :  { %440 = vmatpush1.msra.mxu0 %v2202_v26  ;;  %511 = vmatpush1.msra.mxu1 %v2204_v27  ;;  %v2226_v35 = vld [vmem:[#allocation4 + $0x190] sm:$0xff]  ;;  %v2230_v36 = vld [vmem:[#allocation4 + $0x168] sm:$0xff]  ;;  %v2232_v37 = vld [vmem:[#allocation4 + $0x178] sm:$0xff] }
  0x1b   :  { %1861 = vset.pattern.permute.xlu1 %v2091_v1  ;;  %206 = vperm.xlu0 %1858, %v41_v12   ;;  %v2236_v38 = vld [vmem:[#allocation4 + $0x160] sm:$0xff]  ;;  %v2238_v39 = vld [vmem:[#allocation4 + $0x170] sm:$0xff]  ;;  %v2242_v40 = vld [vmem:[#allocation4 + $0x148] sm:$0xff] }
  0x1c   :  { %82 = vperm.xlu1 %1861, %v41_v12   ;;  %441 = vmatprep.subr.mxu0 %v2206_v28  ;;  %v2244_v41 = vld [vmem:[#allocation4 + $0x158] sm:$0xff]  ;;  %v2248_v42 = vld [vmem:[#allocation4 + $0x140] sm:$0xff]  ;;  %v2250_v43 = vld [vmem:[#allocation4 + $0x150] sm:$0xff] }
  0x1d   :  { %512 = vmatprep.subr.mxu1 %v2210_v29  ;;  %442 = vmatpush1.msra.mxu0 %v2214_v30  ;;  %v2254_v44 = vld [vmem:[#allocation4 + $0x128] sm:$0xff]  ;;  %v2256_v45 = vld [vmem:[#allocation4 + $0x138] sm:$0xff]  ;;  %v2260_v46 = vld [vmem:[#allocation4 + $0x120] sm:$0xff] }
  0x1e   :  { %513 = vmatpush1.msra.mxu1 %v2216_v31  ;;  %443 = vmatprep.subr.mxu0 %v2219_v32  ;;  %v2262_v47 = vld [vmem:[#allocation4 + $0x130] sm:$0xff]  ;;  %v2266_v48 = vld [vmem:[#allocation4 + $0x108] sm:$0xff]  ;;  %v2268_v49 = vld [vmem:[#allocation4 + $0x118] sm:$0xff] }
  0x1f   :  { %210 = vperm.xlu0 %1858, %v42_v15   ;;  %514 = vmatprep.subr.mxu1 %v2221_v33  ;;  %v2272_v50 = vld [vmem:[#allocation4 + $0x100] sm:$0xff]  ;;  %v2274_v51 = vld [vmem:[#allocation4 + $0x110] sm:$0xff]  ;;  %v2278_v52 = vld [vmem:[#allocation4 + $0xe8] sm:$0xff] }
  0x20   :  { %87 = vperm.xlu1 %1861, %v42_v15   ;;  %444 = vmatpush1.msra.mxu0 %v2224_v34  ;;  %v2280_v53 = vld [vmem:[#allocation4 + $0xf8] sm:$0xff]  ;;  %v2284_v54 = vld [vmem:[#allocation4 + $0xe0] sm:$0xff]  ;;  %v2286_v55 = vld [vmem:[#allocation4 + $0xf0] sm:$0xff] }
  0x21   :  { %515 = vmatpush1.msra.mxu1 %v2226_v35  ;;  %445 = vmatprep.subr.mxu0 %v2230_v36  ;;  %v2290_v56 = vld [vmem:[#allocation4 + $0xc8] sm:$0xff]  ;;  %v2292_v57 = vld [vmem:[#allocation4 + $0xd8] sm:$0xff]  ;;  %v2296_v58 = vld [vmem:[#allocation4 + $0xc0] sm:$0xff] }
  0x22   :  { %516 = vmatprep.subr.mxu1 %v2232_v37  ;;  %446 = vmatpush1.msra.mxu0 %v2236_v38  ;;  %v2298_v59 = vld [vmem:[#allocation4 + $0xd0] sm:$0xff]  ;;  %v2302_v60 = vld [vmem:[#allocation4 + $0xa8] sm:$0xff]  ;;  %v2304_v61 = vld [vmem:[#allocation4 + $0xb8] sm:$0xff] }
  0x23   :  { %214 = vperm.xlu0 %1858, %v43_v16   ;;  %517 = vmatpush1.msra.mxu1 %v2238_v39  ;;  %3399 = vst [vmem:[#allocation12_spill] sm:$0xff] %v2302_v60  ;;  %3400 = vst [vmem:[#allocation13_spill] sm:$0xff] %v2304_v61  ;;  %v2308_v62 = vld [vmem:[#allocation4 + $0xa0] sm:$0xff]  ;;  %v2310_v63 = vld [vmem:[#allocation4 + $0xb0] sm:$0xff] }
  0x24   :  { %92 = vperm.xlu1 %1861, %v43_v16   ;;  %447 = vmatprep.subr.mxu0 %v2242_v40  ;;  %3401 = vst [vmem:[#allocation14_spill] sm:$0xff] %v2308_v62  ;;  %3402 = vst [vmem:[#allocation15_spill] sm:$0xff] %v2310_v63  ;;  %v2314_v0 = vld [vmem:[#allocation4 + $0x88] sm:$0xff]  ;;  %v2316_v1 = vld [vmem:[#allocation4 + $0x98] sm:$0xff] }
  0x25   :  { %518 = vmatprep.subr.mxu1 %v2244_v41  ;;  %448 = vmatpush1.msra.mxu0 %v2248_v42  ;;  %3403 = vst [vmem:[#allocation16_spill] sm:$0xff] %v2314_v0  ;;  %3404 = vst [vmem:[#allocation17_spill] sm:$0xff] %v2316_v1  ;;  %v2320_v2 = vld [vmem:[#allocation4 + $0x80] sm:$0xff]  ;;  %v2322_v4 = vld [vmem:[#allocation4 + $0x90] sm:$0xff] }
  0x26   :  { %519 = vmatpush1.msra.mxu1 %v2250_v43  ;;  %449 = vmatprep.subr.mxu0 %v2254_v44  ;;  %3405 = vst [vmem:[#allocation18_spill] sm:$0xff] %v2320_v2  ;;  %3406 = vst [vmem:[#allocation19_spill] sm:$0xff] %v2322_v4  ;;  %v2326_v5 = vld [vmem:[#allocation4 + $0x68] sm:$0xff]  ;;  %v2328_v6 = vld [vmem:[#allocation4 + $0x78] sm:$0xff] }
  0x27   :  { %218 = vperm.xlu0 %1858, %v44_v17   ;;  %520 = vmatprep.subr.mxu1 %v2256_v45  ;;  %3407 = vst [vmem:[#allocation20_spill] sm:$0xff] %v2326_v5  ;;  %3408 = vst [vmem:[#allocation21_spill] sm:$0xff] %v2328_v6  ;;  %v2332_v9 = vld [vmem:[#allocation4 + $0x60] sm:$0xff]  ;;  %v2334_v12 = vld [vmem:[#allocation4 + $0x70] sm:$0xff] }
  0x28   :  { %97 = vperm.xlu1 %1861, %v44_v17   ;;  %450 = vmatpush1.msra.mxu0 %v2260_v46  ;;  %3409 = vst [vmem:[#allocation22_spill] sm:$0xff] %v2332_v9  ;;  %3410 = vst [vmem:[#allocation23_spill] sm:$0xff] %v2334_v12  ;;  %v2338_v15 = vld [vmem:[#allocation4 + $0x48] sm:$0xff]  ;;  %v2340_v16 = vld [vmem:[#allocation4 + $0x58] sm:$0xff] }
  0x29   :  { %521 = vmatpush1.msra.mxu1 %v2262_v47  ;;  %451 = vmatprep.subr.mxu0 %v2266_v48  ;;  %3411 = vst [vmem:[#allocation24_spill] sm:$0xff] %v2338_v15  ;;  %3412 = vst [vmem:[#allocation25_spill] sm:$0xff] %v2340_v16  ;;  %v2344_v17 = vld [vmem:[#allocation4 + $0x40] sm:$0xff]  ;;  %v2352_v11 = vld [vmem:[#allocation4 + $0x38] sm:$0xff] }
  0x2a   :  { %522 = vmatprep.subr.mxu1 %v2268_v49  ;;  %452 = vmatpush1.msra.mxu0 %v2272_v50  ;;  %3413 = vst [vmem:[#allocation26_spill] sm:$0xff] %v2344_v17  ;;  %3416 = vst [vmem:[#allocation29_spill] sm:$0xff] %v2352_v11  ;;  %v2356_v14 = vld [vmem:[#allocation4 + $0x20] sm:$0xff]  ;;  %v2358_v8 = vld [vmem:[#allocation4 + $0x30] sm:$0xff] }
  0x2b   :  { %222 = vperm.xlu0 %1858, %v45_v18   ;;  %523 = vmatpush1.msra.mxu1 %v2274_v51  ;;  %3417 = vst [vmem:[#allocation30_spill] sm:$0xff] %v2356_v14  ;;  %3418 = vst [vmem:[#allocation31_spill] sm:$0xff] %v2358_v8 }
  0x2c   :  { %102 = vperm.xlu1 %1861, %v45_v18   ;;  %453 = vmatprep.subr.mxu0 %v2278_v52  ;;  %v2346_v18 = vld [vmem:[#allocation4 + $0x50] sm:$0xff] }
  0x2d   :  { %524 = vmatprep.subr.mxu1 %v2280_v53  ;;  %454 = vmatpush1.msra.mxu0 %v2284_v54  ;;  %3414 = vst [vmem:[#allocation27_spill] sm:$0xff] %v2346_v18 }
  0x2e   :  { %525 = vmatpush1.msra.mxu1 %v2286_v55  ;;  %455 = vmatprep.subr.mxu0 %v2290_v56 }
  0x2f   :  { %226 = vperm.xlu0 %1858, %v46_v23   ;;  %526 = vmatprep.subr.mxu1 %v2292_v57 }
  0x30   :  { %107 = vperm.xlu1 %1861, %v46_v23   ;;  %456 = vmatpush1.msra.mxu0 %v2296_v58  ;;  %v2350_v23 = vld [vmem:[#allocation4 + $0x28] sm:$0xff] }
  0x31   :  { %527 = vmatpush1.msra.mxu1 %v2298_v59  ;;  %457 = vmatprep.subr.mxu0 %v2302_v60  ;;  %3415 = vst [vmem:[#allocation28_spill] sm:$0xff] %v2350_v23 }
  0x32   :  { %528 = vmatprep.subr.mxu1 %v2304_v61  ;;  %458 = vmatpush1.msra.mxu0 %v2308_v62 }
  0x33   :  { %529 = vmatpush1.msra.mxu1 %v2310_v63  ;;  %459 = vmatprep.subr.mxu0 %v2314_v0  ;;  %v63_v0 = vsub.s32 3, %v2135_v3 }
  0x34   :  { %530 = vmatprep.subr.mxu1 %v2316_v1  ;;  %460 = vmatpush1.msra.mxu0 %v2320_v2 }
  0x35   :  { %531 = vmatpush1.msra.mxu1 %v2322_v4  ;;  %461 = vmatprep.subr.mxu0 %v2326_v5 }
  0x36   :  { %532 = vmatprep.subr.mxu1 %v2328_v6  ;;  %462 = vmatpush1.msra.mxu0 %v2332_v9  ;;  %v2362_v6 = vld [vmem:[#allocation4 + $0x8] sm:$0xff]  ;;  %v2364_v9 = vld [vmem:[#allocation4 + $0x18] sm:$0xff] }
  0x37   :  { %533 = vmatpush1.msra.mxu1 %v2334_v12  ;;  %463 = vmatprep.subr.mxu0 %v2338_v15  ;;  %3419 = vst [vmem:[#allocation32_spill] sm:$0xff] %v2362_v6  ;;  %3420 = vst [vmem:[#allocation33_spill] sm:$0xff] %v2364_v9  ;;  %v2368_v12 = vld [vmem:[#allocation4] sm:$0xff] }
  0x38   :  { %534 = vmatprep.subr.mxu1 %v2340_v16  ;;  %464 = vmatpush1.msra.mxu0 %v2344_v17  ;;  %3421 = vst [vmem:[#allocation34_spill] sm:$0xff] %v2368_v12  ;;  %v2372_v16 = vld [vmem:[#allocation4 + $0x10] sm:$0xff] }
  0x39   :  { %535 = vmatpush1.msra.mxu1 %v2346_v18  ;;  %465 = vmatprep.subr.mxu0 %v2350_v23  ;;  %3422 = vst [vmem:[#allocation35_spill] sm:$0xff] %v2372_v16  ;;  %v3264_v18 = vmov 0.0  }
  0x3a   :  { %536 = vmatprep.subr.mxu1 %v2352_v11  ;;  %466 = vmatpush1.msra.mxu0 %v2356_v14  ;;  %v59_v11 = vsub.s32 2, %v2135_v3 }
  0x3b   :  { %537 = vmatpush1.msra.mxu1 %v2358_v8  ;;  %467 = vmatprep.subr.mxu0 %v2362_v6  ;;  %v51_v8 = vsub.s32 0, %v2135_v3 }
  0x3c   :  { %538 = vmatprep.subr.mxu1 %v2364_v9  ;;  %468 = vmatpush1.msra.mxu0 %v2368_v12  ;;  %v2400_v23 = vrot.slane %v2147_v7, %v59_v11  ;;  %v2409_v2 = vrot.slane %v2155_v10, %v59_v11 }
  0x3d   :  { %501 = vmatprep.mubr.f32.mxu0 %v3264_v18  ;;  %539 = vmatpush1.msra.mxu1 %v2372_v16  ;;  %v2384_v14 = vrot.slane %v2147_v7, %v51_v8  ;;  %v2389_v12 = vrot.slane %v2166_v13, %v51_v8 }
  0x3e   :  { %572 = vmatprep.mubr.f32.mxu1 %v3264_v18  ;;  %608 = vmatprep.subr.mxu0 %v2183_v19  ;;  %3424 = vst [vmem:[#allocation37_spill] sm:$0xff] %v2400_v23  ;;  %3426 = vst [vmem:[#allocation39_spill] sm:$0xff] %v2409_v2 }
  0x3f   :  { %679 = vmatprep.subr.mxu1 %v2185_v20  ;;  %v2396_v20 = vrot.slane %v2155_v10, %v51_v8 }
  0x8d   :  { %v73_v6 = vpop.permute.xlu0 %72  ;;  %v2386_v9 = vpop.permute.xlu1 %77 }
  0x8e   :  { %3423 = vst [vmem:[#allocation36_spill] sm:$0xff] %v2386_v9  ;;  %v135_v18 = vmul.f32 %v2384_v14, %v2386_v9  ;;  %v131_v19 = vmul.f32 %v2384_v14, %v73_v6  ;;  %v133_v63 = vmul.f32 %v2400_v23, %v73_v6 }
  0x90   :  { %v167_v16 = vadd.f32 %v135_v18, %v2389_v12  ;;  %v163_v5 = vadd.f32 %v131_v19, %v2389_v12  ;;  %v2414_v18 = vrot.slane %v2166_v13, %v59_v11 }
  0x92   :  { %v199_v17 = vpop.permute.xlu0 %198  ;;  %v2402_v15 = vpop.permute.xlu1 %202  ;;  %3428 = vst [vmem:[#allocation41_spill] sm:$0xff] %v2414_v18  ;;  %v165_v11 = vadd.f32 %v133_v63, %v2414_v18  ;;  %v2444_v63 = vrot.slane %v2166_v13, %v63_v0 }
  0x93   :  { %3425 = vst [vmem:[#allocation38_spill] sm:$0xff] %v2402_v15  ;;  %v250_v4 = vmul.f32 %v2396_v20, %v199_v17  ;;  %v254_v9 = vmul.f32 %v2396_v20, %v2402_v15  ;;  %v252_v15 = vmul.f32 %v2409_v2, %v199_v17 }
  0x95   :  { %v282_v8 = vadd.f32 %v250_v4, %v163_v5  ;;  %v2411_v1 = vadd.f32 %v254_v9, %v167_v16  ;;  %v2426_v4 = vrot.slane %v2147_v7, %v63_v0  ;;  %v284_v2 = vadd.f32 %v252_v15, %v165_v11 }
  0x96   :  { %v2418_v62 = vpop.permute.xlu0 %206 }
  0x97   :  { %3427 = vst [vmem:[#allocation40_spill] sm:$0xff] %v2411_v1  ;;  %3429 = vst [vmem:[#allocation42_spill] sm:$0xff] %v2418_v62  ;;  %v1821_v19 = vmul.f32 -1.442695, %v282_v8  ;;  %v2420_v61 = vpop.permute.xlu1 %82  ;;  %v258_v16 = vmul.f32 %v2396_v20, %v2418_v62  ;;  %v2437_v8 = vrot.slane %v2155_v10, %v63_v0  ;;  %v1822_v11 = vmul.f32 -1.442695, %v284_v2 }
  0x98   :  { %3430 = vst [vmem:[#allocation43_spill] sm:$0xff] %v2420_v61  ;;  %v139_v60 = vmul.f32 %v2384_v14, %v2420_v61  ;;  %v134_v61 = vmul.f32 %v2426_v4, %v73_v6  ;;  %v3467_v62 = vld [vmem:[#allocation32_spill] sm:$0xff] }
  0x99   :  { %1862 = vpow2.f32 %v1821_v19  ;;  %v253_v15 = vmul.f32 %v2437_v8, %v199_v17 }
  0x9a   :  { %v2429_v5 = vpop.permute.xlu0 %210  ;;  %v171_v3 = vadd.f32 %v139_v60, %v2389_v12  ;;  %v166_v13 = vadd.f32 %v134_v61, %v2444_v63  ;;  %1864 = vpow2.f32 %v1822_v11 }
  0x9b   :  { %3431 = vst [vmem:[#allocation44_spill] sm:$0xff] %v2429_v5  ;;  %v2432_v9 = vpop.permute.xlu1 %87  ;;  %v262_v10 = vmul.f32 %v2396_v20, %v2429_v5 }
  0x9c   :  { %3432 = vst [vmem:[#allocation45_spill] sm:$0xff] %v2432_v9  ;;  %v143_v19 = vmul.f32 %v2384_v14, %v2432_v9  ;;  %v2441_v7 = vadd.f32 %v258_v16, %v171_v3  ;;  %v285_v5 = vadd.f32 %v253_v15, %v166_v13 }
  0x9e   :  { %3433 = vst [vmem:[#allocation46_spill] sm:$0xff] %v2441_v7  ;;  %v2447_v60 = vpop.permute.xlu0 %214  ;;  %v175_v18 = vadd.f32 %v143_v19, %v2389_v12  ;;  %1866 = vtanh.f32 %v285_v5  ;;  %v3466_v7 = vld [vmem:[#allocation31_spill] sm:$0xff] }
  0x9f   :  { %3434 = vst [vmem:[#allocation47_spill] sm:$0xff] %v2447_v60  ;;  %v2450_v1 = vpop.permute.xlu1 %92  ;;  %v266_v9 = vmul.f32 %v2396_v20, %v2447_v60  ;;  %v3465_v60 = vld [vmem:[#allocation30_spill] sm:$0xff] }
  0xa0   :  { %3435 = vst [vmem:[#allocation48_spill] sm:$0xff] %v2450_v1  ;;  %v147_v3 = vmul.f32 %v2384_v14, %v2450_v1  ;;  %v2457_v16 = vadd.f32 %v262_v10, %v175_v18 }
  0xa2   :  { %3436 = vst [vmem:[#allocation49_spill] sm:$0xff] %v2457_v16  ;;  %v2460_v0 = vpop.permute.xlu0 %218  ;;  %v179_v6 = vadd.f32 %v147_v3, %v2389_v12 }
  0xa3   :  { %3437 = vst [vmem:[#allocation50_spill] sm:$0xff] %v2460_v0  ;;  %v2463_v19 = vpop.permute.xlu1 %97  ;;  %v270_v3 = vmul.f32 %v2396_v20, %v2460_v0 }
  0xa4   :  { %3438 = vst [vmem:[#allocation51_spill] sm:$0xff] %v2463_v19  ;;  %v151_v2 = vmul.f32 %v2384_v14, %v2463_v19  ;;  %v2469_v17 = vadd.f32 %v266_v9, %v179_v6 }
  0xa6   :  { %3439 = vst [vmem:[#allocation52_spill] sm:$0xff] %v2469_v17  ;;  %v1863_v18 = vpop.eup %1862  ;;  %v2471_v10 = vpop.permute.xlu0 %222  ;;  %v183_v61 = vadd.f32 %v151_v2, %v2389_v12  ;;  %v3464_v17 = vld [vmem:[#allocation29_spill] sm:$0xff] }
  0xa7   :  { %3440 = vst [vmem:[#allocation53_spill] sm:$0xff] %v2471_v10  ;;  %v419_v1 = vadd.f32 1.0, %v1863_v18  ;;  %v2474_v16 = vpop.permute.xlu1 %102  ;;  %v274_v2 = vmul.f32 %v2396_v20, %v2471_v10 }
  0xa8   :  { %3441 = vst [vmem:[#allocation54_spill] sm:$0xff] %v2474_v16  ;;  %v155_v15 = vmul.f32 %v2384_v14, %v2474_v16  ;;  %v2480_v11 = vadd.f32 %v270_v3, %v183_v61  ;;  %v1865_v3 = vpop.eup %1864 }
  0xa9   :  { %1868 = vrcp.f32 %v419_v1 }
  0xaa   :  { %3442 = vst [vmem:[#allocation55_spill] sm:$0xff] %v2480_v11  ;;  %v187_v9 = vadd.f32 %v155_v15, %v2389_v12  ;;  %v2483_v13 = vpop.permute.xlu0 %226  ;;  %v420_v15 = vadd.f32 1.0, %v1865_v3  ;;  %v3455_v3 = vld [vmem:[#allocation20_spill] sm:$0xff] }
  0xab   :  { %3443 = vst [vmem:[#allocation56_spill] sm:$0xff] %v2483_v13  ;;  %v2485_v6 = vpop.permute.xlu1 %107  ;;  %v278_v5 = vmul.f32 %v2396_v20, %v2483_v13  ;;  %v1867_v16 = vpop.eup %1866  ;;  %v3447_v20 = vld [vmem:[#allocation12_spill] sm:$0xff]  ;;  %v3461_v13 = vld [vmem:[#allocation26_spill] sm:$0xff] }
  0xac   :  { %3444 = vst [vmem:[#allocation57_spill] sm:$0xff] %v2485_v6  ;;  %v159_v18 = vmul.f32 %v2384_v14, %v2485_v6  ;;  %v2491_v0 = vadd.f32 %v274_v2, %v187_v9  ;;  %1870 = vrcp.f32 %v420_v15  ;;  %v3456_v15 = vld [vmem:[#allocation21_spill] sm:$0xff]  ;;  %v3462_v6 = vld [vmem:[#allocation27_spill] sm:$0xff] }
  0xae   :  { %3445 = vst [vmem:[#allocation58_spill] sm:$0xff] %v2491_v0  ;;  %v191_v1 = vadd.f32 %v159_v18, %v2389_v12  ;;  %v3448_v12 = vld [vmem:[#allocation13_spill] sm:$0xff]  ;;  %v3463_v0 = vld [vmem:[#allocation28_spill] sm:$0xff] }
  0xaf   :  { %v3452_v18 = vld [vmem:[#allocation17_spill] sm:$0xff] }
  0xb0   :  { %v2496_v61 = vadd.f32 %v278_v5, %v191_v1  ;;  %v3453_v5 = vld [vmem:[#allocation18_spill] sm:$0xff]  ;;  %v3454_v1 = vld [vmem:[#allocation19_spill] sm:$0xff] }
  0xb2   :  { %3446 = vst [vmem:[#allocation59_spill] sm:$0xff] %v2496_v61  ;;  %v3460_v61 = vld [vmem:[#allocation25_spill] sm:$0xff] }
  0xb6   :  { %v1869_v11 = vpop.eup %1868 }
  0xb7   :  { %v426_v19 = vmul.f32 %v1869_v11, %v1867_v16  ;;  %v3449_v16 = vld [vmem:[#allocation14_spill] sm:$0xff]  ;;  %v3451_v11 = vld [vmem:[#allocation16_spill] sm:$0xff] }
  0xb9   :  { %1872 = vtanh.f32 %v426_v19  ;;  %v2498_v10 = vsel %vm429_vm0, %v426_v19, 0.0  ;;  %v1871_v14 = vpop.eup %1870  ;;  %v3450_v19 = vld [vmem:[#allocation15_spill] sm:$0xff] }
  0xc6   :  { %v1873_v9 = vpop.eup %1872 }
  0xc7   :  { %v428_v2 = vmul.f32 %v1873_v9, %v1871_v14  ;;  %v3457_v14 = vld [vmem:[#allocation22_spill] sm:$0xff]  ;;  %v3458_v9 = vld [vmem:[#allocation23_spill] sm:$0xff] }
  0xc9   :  { %1823 = vmatmul.mubr.msk.f32.vlgmr.msra.gmra.mxu0 %vm429_vm0, %v428_v2  ;;  %1824 = vmatmul.mubr.msk.f32.vlgmr.msra.gmra.mxu1 %vm429_vm0, %v428_v2  ;;  %v3459_v2 = vld [vmem:[#allocation24_spill] sm:$0xff] }
  0xca   :  { %609 = vmatpush1.msra.mxu0 %v2189_v21  ;;  %680 = vmatpush1.msra.mxu1 %v2191_v22 }
  0xcb   :  { %610 = vmatprep.subr.mxu0 %v2197_v24  ;;  %681 = vmatprep.subr.mxu1 %v2199_v25 }
  0xcc   :  { %611 = vmatpush1.msra.mxu0 %v2202_v26  ;;  %682 = vmatpush1.msra.mxu1 %v2204_v27 }
  0xcd   :  { %612 = vmatprep.subr.mxu0 %v2206_v28  ;;  %683 = vmatprep.subr.mxu1 %v2210_v29 }
  0xce   :  { %613 = vmatpush1.msra.mxu0 %v2214_v30  ;;  %684 = vmatpush1.msra.mxu1 %v2216_v31 }
  0xcf   :  { %614 = vmatprep.subr.mxu0 %v2219_v32  ;;  %685 = vmatprep.subr.mxu1 %v2221_v33 }
  0xd0   :  { %615 = vmatpush1.msra.mxu0 %v2224_v34  ;;  %686 = vmatpush1.msra.mxu1 %v2226_v35 }
  0xd1   :  { %616 = vmatprep.subr.mxu0 %v2230_v36  ;;  %687 = vmatprep.subr.mxu1 %v2232_v37 }
  0xd2   :  { %617 = vmatpush1.msra.mxu0 %v2236_v38  ;;  %688 = vmatpush1.msra.mxu1 %v2238_v39 }
  0xd3   :  { %618 = vmatprep.subr.mxu0 %v2242_v40  ;;  %689 = vmatprep.subr.mxu1 %v2244_v41 }
  0xd4   :  { %619 = vmatpush1.msra.mxu0 %v2248_v42  ;;  %690 = vmatpush1.msra.mxu1 %v2250_v43 }
  0xd5   :  { %620 = vmatprep.subr.mxu0 %v2254_v44  ;;  %691 = vmatprep.subr.mxu1 %v2256_v45 }
  0xd6   :  { %621 = vmatpush1.msra.mxu0 %v2260_v46  ;;  %692 = vmatpush1.msra.mxu1 %v2262_v47 }
  0xd7   :  { %622 = vmatprep.subr.mxu0 %v2266_v48  ;;  %693 = vmatprep.subr.mxu1 %v2268_v49 }
  0xd8   :  { %623 = vmatpush1.msra.mxu0 %v2272_v50  ;;  %694 = vmatpush1.msra.mxu1 %v2274_v51 }
  0xd9   :  { %624 = vmatprep.subr.mxu0 %v2278_v52  ;;  %695 = vmatprep.subr.mxu1 %v2280_v53 }
  0xda   :  { %625 = vmatpush1.msra.mxu0 %v2284_v54  ;;  %696 = vmatpush1.msra.mxu1 %v2286_v55 }
  0xdb   :  { %626 = vmatprep.subr.mxu0 %v2290_v56  ;;  %697 = vmatprep.subr.mxu1 %v2292_v57 }
  0xdc   :  { %627 = vmatpush1.msra.mxu0 %v2296_v58  ;;  %698 = vmatpush1.msra.mxu1 %v2298_v59 }
  0xdd   :  { %628 = vmatprep.subr.mxu0 %v3447_v20  ;;  %699 = vmatprep.subr.mxu1 %v3448_v12 }
  0xde   :  { %629 = vmatpush1.msra.mxu0 %v3449_v16  ;;  %700 = vmatpush1.msra.mxu1 %v3450_v19 }
  0xdf   :  { %630 = vmatprep.subr.mxu0 %v3451_v11  ;;  %701 = vmatprep.subr.mxu1 %v3452_v18 }
  0xe0   :  { %631 = vmatpush1.msra.mxu0 %v3453_v5  ;;  %702 = vmatpush1.msra.mxu1 %v3454_v1  ;;  %v3479_v5 = vld [vmem:[#allocation40_spill] sm:$0xff] }
  0xe1   :  { %632 = vmatprep.subr.mxu0 %v3455_v3  ;;  %703 = vmatprep.subr.mxu1 %v3456_v15  ;;  %v3478_v3 = vld [vmem:[#allocation8_spill] sm:$0xff] }
  0xe2   :  { %633 = vmatpush1.msra.mxu0 %v3457_v14  ;;  %704 = vmatpush1.msra.mxu1 %v3458_v9  ;;  %v3468_v14 = vld [vmem:[#allocation33_spill] sm:$0xff]  ;;  %v3469_v9 = vld [vmem:[#allocation34_spill] sm:$0xff] }
  0xe3   :  { %634 = vmatprep.subr.mxu0 %v3459_v2  ;;  %705 = vmatprep.subr.mxu1 %v3460_v61  ;;  %v3470_v2 = vmov 0.0   ;;  %v3471_v61 = vld [vmem:[#allocation35_spill] sm:$0xff] }
  0xe4   :  { %635 = vmatpush1.msra.mxu0 %v3461_v13  ;;  %706 = vmatpush1.msra.mxu1 %v3462_v6  ;;  %v3472_v6 = vld [vmem:[#allocation10_spill] sm:$0xff] }
  0xe5   :  { %636 = vmatprep.subr.mxu0 %v3463_v0  ;;  %707 = vmatprep.subr.mxu1 %v3464_v17  ;;  %v3473_v0 = vld [vmem:[#allocation11_spill] sm:$0xff]  ;;  %v3474_v17 = vld [vmem:[#allocation36_spill] sm:$0xff] }
  0xe6   :  { %637 = vmatpush1.msra.mxu0 %v3465_v60  ;;  %708 = vmatpush1.msra.mxu1 %v3466_v7  ;;  %v3475_v60 = vld [vmem:[#allocation7_spill] sm:$0xff]  ;;  %v3476_v7 = vld [vmem:[#allocation9_spill] sm:$0xff] }
  0xe7   :  { %638 = vmatprep.subr.mxu0 %v3467_v62  ;;  %709 = vmatprep.subr.mxu1 %v3468_v14  ;;  %v136_v13 = vmul.f32 %v3475_v60, %v3474_v17  ;;  %v3477_v62 = vld [vmem:[#allocation38_spill] sm:$0xff] }
  0xe8   :  { %639 = vmatpush1.msra.mxu0 %v3469_v9  ;;  %672 = vmatprep.mubr.f32.mxu0 %v3470_v2  ;;  %v255_v14 = vmul.f32 %v3478_v3, %v3477_v62  ;;  %v137_v9 = vmul.f32 %v2400_v23, %v3474_v17  ;;  %v138_v3 = vmul.f32 %v2426_v4, %v3474_v17 }
  0xe9   :  { %710 = vmatpush1.msra.mxu1 %v3471_v61  ;;  %743 = vmatprep.mubr.f32.mxu1 %v3470_v2  ;;  %v168_v15 = vadd.f32 %v136_v13, %v3476_v7 }
  0xea   :  { %779 = vmatprep.subr.mxu0 %v3472_v6  ;;  %850 = vmatprep.subr.mxu1 %v3473_v0  ;;  %v3480_v6 = vld [vmem:[#allocation41_spill] sm:$0xff]  ;;  %v3481_v0 = vld [vmem:[#allocation39_spill] sm:$0xff]  ;;  %v170_v12 = vadd.f32 %v138_v3, %v2444_v63 }
  0xeb   :  { %v287_v18 = vadd.f32 %v255_v14, %v168_v15  ;;  %v169_v19 = vadd.f32 %v137_v9, %v3480_v6  ;;  %v256_v16 = vmul.f32 %v3481_v0, %v3477_v62 }
  0xed   :  { %v288_v7 = vadd.f32 %v256_v16, %v169_v19 }
 0x189   :  { %v503_v1 = vpop.f32.mrf.mxu0  ;;  %v574_v23 = vpop.f32.mrf.mxu1 }
 0x18a   :  { %v504_v61 = vadd.f32 %v503_v1, %v3479_v5  ;;  %v257_v5 = vmul.f32 %v2437_v8, %v3477_v62 }
 0x18b   :  { %v505_v2 = vpop.f32.mrf.mxu0  ;;  %v576_v1 = vpop.f32.mrf.mxu1 }
 0x18c   :  { %v1825_v11 = vmul.f32 -1.442695, %v504_v61  ;;  %v506_v60 = vadd.f32 %v505_v2, %v287_v18  ;;  %v575_v61 = vadd.f32 %v574_v23, %v288_v7  ;;  %v289_v15 = vadd.f32 %v257_v5, %v170_v12  ;;  %v3483_v5 = vld [vmem:[#allocation14_spill] sm:$0xff] }
 0x18e   :  { %1874 = vpow2.f32 %v1825_v11  ;;  %v1826_v13 = vmul.f32 -1.442695, %v506_v60  ;;  %v1827_v14 = vmul.f32 -1.442695, %v575_v61  ;;  %v577_v9 = vadd.f32 %v576_v1, %v289_v15  ;;  %v3484_v61 = vld [vmem:[#allocation15_spill] sm:$0xff]  ;;  %v3485_v1 = vld [vmem:[#allocation16_spill] sm:$0xff] }
 0x18f   :  { %v3486_v15 = vld [vmem:[#allocation17_spill] sm:$0xff] }
 0x190   :  { %1876 = vpow2.f32 %v1826_v13 }
 0x191   :  { %1878 = vpow2.f32 %v1827_v14  ;;  %v3487_v14 = vld [vmem:[#allocation18_spill] sm:$0xff] }
 0x192   :  { %1880 = vtanh.f32 %v577_v9  ;;  %v3488_v9 = vld [vmem:[#allocation19_spill] sm:$0xff] }
 0x19b   :  { %v1875_v0 = vpop.eup %1874 }
 0x19c   :  { %v588_v18 = vadd.f32 1.0, %v1875_v0 }
 0x19d   :  { %v1877_v60 = vpop.eup %1876 }
 0x19e   :  { %1882 = vrcp.f32 %v588_v18  ;;  %v589_v17 = vadd.f32 1.0, %v1877_v60  ;;  %v1879_v16 = vpop.eup %1878  ;;  %v3489_v18 = vld [vmem:[#allocation20_spill] sm:$0xff]  ;;  %v3490_v60 = vld [vmem:[#allocation21_spill] sm:$0xff] }
 0x19f   :  { %v1881_v19 = vpop.eup %1880  ;;  %v590_v13 = vadd.f32 1.0, %v1879_v16  ;;  %v3492_v16 = vld [vmem:[#allocation23_spill] sm:$0xff] }
 0x1a0   :  { %1884 = vrcp.f32 %v589_v17  ;;  %v3491_v17 = vld [vmem:[#allocation22_spill] sm:$0xff] }
 0x1a1   :  { %1886 = vrcp.f32 %v590_v13  ;;  %v3497_v13 = vld [vmem:[#allocation28_spill] sm:$0xff] }
 0x1ab   :  { %v1883_v11 = vpop.eup %1882 }
 0x1ac   :  { %v599_v3 = vmul.f32 %v1883_v11, %v1881_v19  ;;  %v3493_v19 = vld [vmem:[#allocation24_spill] sm:$0xff]  ;;  %v3494_v11 = vld [vmem:[#allocation25_spill] sm:$0xff] }
 0x1ad   :  { %v1885_v2 = vpop.eup %1884 }
 0x1ae   :  { %v598_v62 = vmul.f32 %v1885_v2, %v2498_v10  ;;  %v1887_v7 = vpop.eup %1886  ;;  %v3482_v10 = vld [vmem:[#allocation13_spill] sm:$0xff]  ;;  %v3496_v2 = vld [vmem:[#allocation27_spill] sm:$0xff] }
 0x1b0   :  { %v2583_v23 = vadd.f32 %v599_v3, %v598_v62  ;;  %v3495_v3 = vld [vmem:[#allocation26_spill] sm:$0xff]  ;;  %v3498_v62 = vld [vmem:[#allocation29_spill] sm:$0xff] }
 0x1b2   :  { %1888 = vtanh.f32 %v2583_v23 }
 0x1bf   :  { %v1889_v0 = vpop.eup %1888 }
 0x1c0   :  { %v602_v12 = vmul.f32 %v1889_v0, %v1887_v7  ;;  %v3499_v7 = vld [vmem:[#allocation30_spill] sm:$0xff]  ;;  %v3500_v0 = vld [vmem:[#allocation31_spill] sm:$0xff] }
 0x1c2   :  { %673 = vmatmul.mubr.f32.vlgmr.msra.gmra.mxu0 %v602_v12  ;;  %744 = vmatmul.mubr.f32.vlgmr.msra.gmra.mxu1 %v602_v12  ;;  %v3501_v12 = vld [vmem:[#allocation32_spill] sm:$0xff] }
 0x1c3   :  { %780 = vmatpush1.msra.mxu0 %v2189_v21  ;;  %851 = vmatpush1.msra.mxu1 %v2191_v22 }
 0x1c4   :  { %781 = vmatprep.subr.mxu0 %v2197_v24  ;;  %852 = vmatprep.subr.mxu1 %v2199_v25 }
 0x1c5   :  { %782 = vmatpush1.msra.mxu0 %v2202_v26  ;;  %853 = vmatpush1.msra.mxu1 %v2204_v27 }
 0x1c6   :  { %783 = vmatprep.subr.mxu0 %v2206_v28  ;;  %854 = vmatprep.subr.mxu1 %v2210_v29 }
 0x1c7   :  { %784 = vmatpush1.msra.mxu0 %v2214_v30  ;;  %855 = vmatpush1.msra.mxu1 %v2216_v31 }
 0x1c8   :  { %785 = vmatprep.subr.mxu0 %v2219_v32  ;;  %856 = vmatprep.subr.mxu1 %v2221_v33 }
 0x1c9   :  { %786 = vmatpush1.msra.mxu0 %v2224_v34  ;;  %857 = vmatpush1.msra.mxu1 %v2226_v35 }
 0x1ca   :  { %787 = vmatprep.subr.mxu0 %v2230_v36  ;;  %858 = vmatprep.subr.mxu1 %v2232_v37 }
 0x1cb   :  { %788 = vmatpush1.msra.mxu0 %v2236_v38  ;;  %859 = vmatpush1.msra.mxu1 %v2238_v39 }
 0x1cc   :  { %789 = vmatprep.subr.mxu0 %v2242_v40  ;;  %860 = vmatprep.subr.mxu1 %v2244_v41 }
 0x1cd   :  { %790 = vmatpush1.msra.mxu0 %v2248_v42  ;;  %861 = vmatpush1.msra.mxu1 %v2250_v43 }
 0x1ce   :  { %791 = vmatprep.subr.mxu0 %v2254_v44  ;;  %862 = vmatprep.subr.mxu1 %v2256_v45 }
 0x1cf   :  { %792 = vmatpush1.msra.mxu0 %v2260_v46  ;;  %863 = vmatpush1.msra.mxu1 %v2262_v47 }
 0x1d0   :  { %793 = vmatprep.subr.mxu0 %v2266_v48  ;;  %864 = vmatprep.subr.mxu1 %v2268_v49 }
 0x1d1   :  { %794 = vmatpush1.msra.mxu0 %v2272_v50  ;;  %865 = vmatpush1.msra.mxu1 %v2274_v51 }
 0x1d2   :  { %795 = vmatprep.subr.mxu0 %v2278_v52  ;;  %866 = vmatprep.subr.mxu1 %v2280_v53 }
 0x1d3   :  { %796 = vmatpush1.msra.mxu0 %v2284_v54  ;;  %867 = vmatpush1.msra.mxu1 %v2286_v55 }
 0x1d4   :  { %797 = vmatprep.subr.mxu0 %v2290_v56  ;;  %868 = vmatprep.subr.mxu1 %v2292_v57 }
 0x1d5   :  { %798 = vmatpush1.msra.mxu0 %v2296_v58  ;;  %869 = vmatpush1.msra.mxu1 %v2298_v59 }
 0x1d6   :  { %799 = vmatprep.subr.mxu0 %v3447_v20  ;;  %870 = vmatprep.subr.mxu1 %v3482_v10 }
 0x1d7   :  { %800 = vmatpush1.msra.mxu0 %v3483_v5  ;;  %871 = vmatpush1.msra.mxu1 %v3484_v61 }
 0x1d8   :  { %801 = vmatprep.subr.mxu0 %v3485_v1  ;;  %872 = vmatprep.subr.mxu1 %v3486_v15  ;;  %v3514_v15 = vld [vmem:[#allocation46_spill] sm:$0xff] }
 0x1d9   :  { %802 = vmatpush1.msra.mxu0 %v3487_v14  ;;  %873 = vmatpush1.msra.mxu1 %v3488_v9 }
 0x1da   :  { %803 = vmatprep.subr.mxu0 %v3489_v18  ;;  %874 = vmatprep.subr.mxu1 %v3490_v60  ;;  %v3512_v18 = vld [vmem:[#allocation8_spill] sm:$0xff] }
 0x1db   :  { %804 = vmatpush1.msra.mxu0 %v3491_v17  ;;  %875 = vmatpush1.msra.mxu1 %v3492_v16  ;;  %v3502_v17 = vld [vmem:[#allocation33_spill] sm:$0xff]  ;;  %v3503_v16 = vld [vmem:[#allocation34_spill] sm:$0xff] }
 0x1dc   :  { %805 = vmatprep.subr.mxu0 %v3493_v19  ;;  %876 = vmatprep.subr.mxu1 %v3494_v11  ;;  %v3504_v19 = vmov 0.0   ;;  %v3505_v11 = vld [vmem:[#allocation35_spill] sm:$0xff] }
 0x1dd   :  { %806 = vmatpush1.msra.mxu0 %v3495_v3  ;;  %877 = vmatpush1.msra.mxu1 %v3496_v2  ;;  %v3506_v2 = vld [vmem:[#allocation10_spill] sm:$0xff] }
 0x1de   :  { %807 = vmatprep.subr.mxu0 %v3497_v13  ;;  %878 = vmatprep.subr.mxu1 %v3498_v62  ;;  %v3507_v13 = vld [vmem:[#allocation11_spill] sm:$0xff] }
 0x1df   :  { %808 = vmatpush1.msra.mxu0 %v3499_v7  ;;  %879 = vmatpush1.msra.mxu1 %v3500_v0  ;;  %v3508_v62 = vld [vmem:[#allocation43_spill] sm:$0xff]  ;;  %v3510_v0 = vld [vmem:[#allocation9_spill] sm:$0xff] }
 0x1e0   :  { %809 = vmatprep.subr.mxu0 %v3501_v12  ;;  %880 = vmatprep.subr.mxu1 %v3502_v17  ;;  %v3509_v7 = vld [vmem:[#allocation7_spill] sm:$0xff]  ;;  %v3511_v12 = vld [vmem:[#allocation42_spill] sm:$0xff] }
 0x1e1   :  { %810 = vmatpush1.msra.mxu0 %v3503_v16  ;;  %843 = vmatprep.mubr.f32.mxu0 %v3504_v19  ;;  %v140_v3 = vmul.f32 %v3509_v7, %v3508_v62  ;;  %v259_v17 = vmul.f32 %v3512_v18, %v3511_v12  ;;  %v3513_v16 = vld [vmem:[#allocation37_spill] sm:$0xff] }
 0x1e2   :  { %881 = vmatpush1.msra.mxu1 %v3505_v11  ;;  %914 = vmatprep.mubr.f32.mxu1 %v3504_v19  ;;  %v141_v14 = vmul.f32 %v3513_v16, %v3508_v62 }
 0x1e3   :  { %950 = vmatprep.subr.mxu0 %v3506_v2  ;;  %1021 = vmatprep.subr.mxu1 %v3507_v13  ;;  %v172_v60 = vadd.f32 %v140_v3, %v3510_v0  ;;  %v142_v3 = vmul.f32 %v2426_v4, %v3508_v62  ;;  %v3515_v0 = vld [vmem:[#allocation39_spill] sm:$0xff] }
 0x1e4   :  { %v173_v13 = vadd.f32 %v141_v14, %v3480_v6  ;;  %v260_v18 = vmul.f32 %v3515_v0, %v3511_v12 }
 0x1e5   :  { %v291_v1 = vadd.f32 %v259_v17, %v172_v60  ;;  %v174_v16 = vadd.f32 %v142_v3, %v2444_v63 }
 0x1e6   :  { %v292_v10 = vadd.f32 %v260_v18, %v173_v13 }
 0x282   :  { %v674_v9 = vpop.f32.mrf.mxu0  ;;  %v745_v7 = vpop.f32.mrf.mxu1 }
 0x283   :  { %v675_v11 = vadd.f32 %v674_v9, %v3514_v15  ;;  %v746_v15 = vadd.f32 %v745_v7, %v292_v10  ;;  %v261_v9 = vmul.f32 %v2437_v8, %v3511_v12 }
 0x284   :  { %v676_v19 = vpop.f32.mrf.mxu0 }
 0x285   :  { %v1828_v61 = vmul.f32 -1.442695, %v675_v11  ;;  %v677_v2 = vadd.f32 %v676_v19, %v291_v1  ;;  %v747_v1 = vpop.f32.mrf.mxu1  ;;  %v1830_v60 = vmul.f32 -1.442695, %v746_v15 }
 0x287   :  { %1890 = vpow2.f32 %v1828_v61  ;;  %v1829_v5 = vmul.f32 -1.442695, %v677_v2  ;;  %v293_v61 = vadd.f32 %v261_v9, %v174_v16 }
 0x289   :  { %1892 = vpow2.f32 %v1829_v5  ;;  %v748_v14 = vadd.f32 %v747_v1, %v293_v61 }
 0x28a   :  { %1894 = vpow2.f32 %v1830_v60 }
 0x28b   :  { %1896 = vtanh.f32 %v748_v14 }
 0x294   :  { %v1891_v17 = vpop.eup %1890 }
 0x295   :  { %v759_v19 = vadd.f32 1.0, %v1891_v17 }
 0x296   :  { %v1893_v11 = vpop.eup %1892 }
 0x297   :  { %1898 = vrcp.f32 %v759_v19  ;;  %v760_v62 = vadd.f32 1.0, %v1893_v11  ;;  %v1895_v5 = vpop.eup %1894 }
 0x298   :  { %v1897_v18 = vpop.eup %1896  ;;  %v761_v7 = vadd.f32 1.0, %v1895_v5 }
 0x299   :  { %1900 = vrcp.f32 %v760_v62 }
 0x29a   :  { %1902 = vrcp.f32 %v761_v7 }
 0x2a4   :  { %v1899_v2 = vpop.eup %1898 }
 0x2a5   :  { %v770_v13 = vmul.f32 %v1899_v2, %v1897_v18 }
 0x2a6   :  { %v1901_v10 = vpop.eup %1900 }
 0x2a7   :  { %v769_v12 = vmul.f32 %v1901_v10, %v2583_v23  ;;  %v1903_v16 = vpop.eup %1902 }
 0x2a9   :  { %v2669_v3 = vadd.f32 %v770_v13, %v769_v12 }
 0x2ab   :  { %1904 = vtanh.f32 %v2669_v3 }
 0x2b8   :  { %v1905_v15 = vpop.eup %1904 }
 0x2b9   :  { %v773_v9 = vmul.f32 %v1905_v15, %v1903_v16 }
 0x2bb   :  { %844 = vmatmul.mubr.f32.vlgmr.msra.gmra.mxu0 %v773_v9  ;;  %915 = vmatmul.mubr.f32.vlgmr.msra.gmra.mxu1 %v773_v9 }
 0x2bc   :  { %951 = vmatpush1.msra.mxu0 %v2189_v21  ;;  %1022 = vmatpush1.msra.mxu1 %v2191_v22  ;;  %v3516_v21 = vld [vmem:[#allocation13_spill] sm:$0xff]  ;;  %v3517_v22 = vld [vmem:[#allocation14_spill] sm:$0xff] }
 0x2bd   :  { %952 = vmatprep.subr.mxu0 %v2197_v24  ;;  %1023 = vmatprep.subr.mxu1 %v2199_v25  ;;  %v3518_v24 = vld [vmem:[#allocation15_spill] sm:$0xff]  ;;  %v3519_v25 = vld [vmem:[#allocation16_spill] sm:$0xff] }
 0x2be   :  { %953 = vmatpush1.msra.mxu0 %v2202_v26  ;;  %1024 = vmatpush1.msra.mxu1 %v2204_v27  ;;  %v3520_v26 = vld [vmem:[#allocation17_spill] sm:$0xff]  ;;  %v3521_v27 = vld [vmem:[#allocation18_spill] sm:$0xff] }
 0x2bf   :  { %954 = vmatprep.subr.mxu0 %v2206_v28  ;;  %1025 = vmatprep.subr.mxu1 %v2210_v29  ;;  %v3522_v28 = vld [vmem:[#allocation19_spill] sm:$0xff]  ;;  %v3523_v29 = vld [vmem:[#allocation20_spill] sm:$0xff] }
 0x2c0   :  { %955 = vmatpush1.msra.mxu0 %v2214_v30  ;;  %1026 = vmatpush1.msra.mxu1 %v2216_v31  ;;  %v3524_v30 = vld [vmem:[#allocation21_spill] sm:$0xff]  ;;  %v3525_v31 = vld [vmem:[#allocation22_spill] sm:$0xff] }
 0x2c1   :  { %956 = vmatprep.subr.mxu0 %v2219_v32  ;;  %1027 = vmatprep.subr.mxu1 %v2221_v33  ;;  %v3526_v32 = vld [vmem:[#allocation23_spill] sm:$0xff]  ;;  %v3527_v33 = vld [vmem:[#allocation24_spill] sm:$0xff] }
 0x2c2   :  { %957 = vmatpush1.msra.mxu0 %v2224_v34  ;;  %1028 = vmatpush1.msra.mxu1 %v2226_v35  ;;  %v3528_v34 = vld [vmem:[#allocation25_spill] sm:$0xff]  ;;  %v3529_v35 = vld [vmem:[#allocation26_spill] sm:$0xff] }
 0x2c3   :  { %958 = vmatprep.subr.mxu0 %v2230_v36  ;;  %1029 = vmatprep.subr.mxu1 %v2232_v37  ;;  %v3530_v36 = vld [vmem:[#allocation27_spill] sm:$0xff]  ;;  %v3531_v37 = vld [vmem:[#allocation28_spill] sm:$0xff] }
 0x2c4   :  { %959 = vmatpush1.msra.mxu0 %v2236_v38  ;;  %1030 = vmatpush1.msra.mxu1 %v2238_v39  ;;  %v3532_v38 = vld [vmem:[#allocation29_spill] sm:$0xff]  ;;  %v3533_v39 = vld [vmem:[#allocation30_spill] sm:$0xff] }
 0x2c5   :  { %960 = vmatprep.subr.mxu0 %v2242_v40  ;;  %1031 = vmatprep.subr.mxu1 %v2244_v41  ;;  %v3534_v40 = vld [vmem:[#allocation31_spill] sm:$0xff]  ;;  %v3535_v41 = vld [vmem:[#allocation32_spill] sm:$0xff] }
 0x2c6   :  { %961 = vmatpush1.msra.mxu0 %v2248_v42  ;;  %1032 = vmatpush1.msra.mxu1 %v2250_v43  ;;  %v3536_v42 = vld [vmem:[#allocation33_spill] sm:$0xff]  ;;  %v3537_v43 = vld [vmem:[#allocation34_spill] sm:$0xff] }
 0x2c7   :  { %962 = vmatprep.subr.mxu0 %v2254_v44  ;;  %1033 = vmatprep.subr.mxu1 %v2256_v45  ;;  %v3538_v44 = vmov 0.0   ;;  %v3539_v45 = vld [vmem:[#allocation35_spill] sm:$0xff] }
 0x2c8   :  { %963 = vmatpush1.msra.mxu0 %v2260_v46  ;;  %1034 = vmatpush1.msra.mxu1 %v2262_v47  ;;  %v2736_v46 = vld [vmem:[#allocation4 + $0x1e8] sm:$0xff]  ;;  %v2739_v47 = vld [vmem:[#allocation4 + $0x1f8] sm:$0xff] }
 0x2c9   :  { %964 = vmatprep.subr.mxu0 %v2266_v48  ;;  %1035 = vmatprep.subr.mxu1 %v2268_v49  ;;  %3540 = vst [vmem:[#allocation12_spill] sm:$0xff] %v2736_v46  ;;  %3541 = vst [vmem:[#allocation36_spill] sm:$0xff] %v2739_v47  ;;  %v3542_v48 = vld [vmem:[#allocation45_spill] sm:$0xff]  ;;  %v3543_v49 = vld [vmem:[#allocation7_spill] sm:$0xff] }
 0x2ca   :  { %965 = vmatpush1.msra.mxu0 %v2272_v50  ;;  %1036 = vmatpush1.msra.mxu1 %v2274_v51  ;;  %v144_v50 = vmul.f32 %v3543_v49, %v3542_v48  ;;  %v3544_v51 = vld [vmem:[#allocation9_spill] sm:$0xff]  ;;  %v146_v19 = vmul.f32 %v2426_v4, %v3542_v48 }
 0x2cb   :  { %966 = vmatprep.subr.mxu0 %v2278_v52  ;;  %1037 = vmatprep.subr.mxu1 %v2280_v53  ;;  %v3545_v53 = vld [vmem:[#allocation44_spill] sm:$0xff] }
 0x2cc   :  { %967 = vmatpush1.msra.mxu0 %v2284_v54  ;;  %1038 = vmatpush1.msra.mxu1 %v2286_v55  ;;  %v176_v52 = vadd.f32 %v144_v50, %v3544_v51  ;;  %v3546_v54 = vld [vmem:[#allocation8_spill] sm:$0xff]  ;;  %v264_v11 = vmul.f32 %v3515_v0, %v3545_v53  ;;  %v178_v18 = vadd.f32 %v146_v19, %v2444_v63  ;;  %v2774_v50 = vld [vmem:[#allocation4 + $0x1c0] sm:$0xff] }
 0x2cd   :  { %968 = vmatprep.subr.mxu0 %v2290_v56  ;;  %1039 = vmatprep.subr.mxu1 %v2292_v57  ;;  %v263_v55 = vmul.f32 %v3546_v54, %v3545_v53  ;;  %v3547_v57 = vld [vmem:[#allocation37_spill] sm:$0xff]  ;;  %v265_v13 = vmul.f32 %v2437_v8, %v3545_v53  ;;  %v2780_v53 = vld [vmem:[#allocation4 + $0x1a8] sm:$0xff] }
 0x2ce   :  { %969 = vmatpush1.msra.mxu0 %v2296_v58  ;;  %1040 = vmatpush1.msra.mxu1 %v2298_v59  ;;  %v145_v58 = vmul.f32 %v3547_v57, %v3542_v48  ;;  %v3548_v59 = vld [vmem:[#allocation49_spill] sm:$0xff]  ;;  %v2768_v48 = vld [vmem:[#allocation4 + $0x1c8] sm:$0xff] }
 0x2cf   :  { %970 = vmatprep.subr.mxu0 %v3447_v20  ;;  %1041 = vmatprep.subr.mxu1 %v3516_v21  ;;  %v295_v23 = vadd.f32 %v263_v55, %v176_v52  ;;  %v297_v7 = vadd.f32 %v265_v13, %v178_v18  ;;  %v2777_v52 = vld [vmem:[#allocation4 + $0x1d0] sm:$0xff]  ;;  %v2783_v55 = vld [vmem:[#allocation4 + $0x1b8] sm:$0xff]  ;;  %v2816_v19 = vld [vmem:[#allocation4 + $0x148] sm:$0xff] }
 0x2d0   :  { %971 = vmatpush1.msra.mxu0 %v3517_v22  ;;  %1042 = vmatpush1.msra.mxu1 %v3518_v24  ;;  %v177_v14 = vadd.f32 %v145_v58, %v3480_v6  ;;  %v2789_v58 = vld [vmem:[#allocation4 + $0x1b0] sm:$0xff]  ;;  %v2828_v18 = vld [vmem:[#allocation4 + $0x128] sm:$0xff]  ;;  %v2834_v13 = vld [vmem:[#allocation4 + $0x120] sm:$0xff] }
 0x2d1   :  { %972 = vmatprep.subr.mxu0 %v3519_v25  ;;  %1043 = vmatprep.subr.mxu1 %v3520_v26 }
 0x2d2   :  { %973 = vmatpush1.msra.mxu0 %v3521_v27  ;;  %1044 = vmatpush1.msra.mxu1 %v3522_v28  ;;  %v296_v5 = vadd.f32 %v264_v11, %v177_v14  ;;  %v2810_v14 = vld [vmem:[#allocation4 + $0x160] sm:$0xff]  ;;  %v2819_v11 = vld [vmem:[#allocation4 + $0x158] sm:$0xff] }
 0x2d3   :  { %974 = vmatprep.subr.mxu0 %v3523_v29  ;;  %1045 = vmatprep.subr.mxu1 %v3524_v30 }
 0x2d4   :  { %975 = vmatpush1.msra.mxu0 %v3525_v31  ;;  %1046 = vmatpush1.msra.mxu1 %v3526_v32 }
 0x2d5   :  { %976 = vmatprep.subr.mxu0 %v3527_v33  ;;  %1047 = vmatprep.subr.mxu1 %v3528_v34 }
 0x2d6   :  { %977 = vmatpush1.msra.mxu0 %v3529_v35  ;;  %1048 = vmatpush1.msra.mxu1 %v3530_v36  ;;  %v2762_v35 = vld [vmem:[#allocation4 + $0x1e0] sm:$0xff]  ;;  %v2765_v36 = vld [vmem:[#allocation4 + $0x1f0] sm:$0xff] }
 0x2d7   :  { %978 = vmatprep.subr.mxu0 %v3531_v37  ;;  %1049 = vmatprep.subr.mxu1 %v3532_v38 }
 0x2d8   :  { %979 = vmatpush1.msra.mxu0 %v3533_v39  ;;  %1050 = vmatpush1.msra.mxu1 %v3534_v40 }
 0x2d9   :  { %980 = vmatprep.subr.mxu0 %v3535_v41  ;;  %1051 = vmatprep.subr.mxu1 %v3536_v42 }
 0x2da   :  { %981 = vmatpush1.msra.mxu0 %v3537_v43  ;;  %1014 = vmatprep.mubr.f32.mxu0 %v3538_v44 }
 0x2db   :  { %1052 = vmatpush1.msra.mxu1 %v3539_v45  ;;  %1085 = vmatprep.mubr.f32.mxu1 %v3538_v44 }
 0x2dc   :  { %1121 = vmatprep.subr.mxu0 %v2736_v46  ;;  %1192 = vmatprep.subr.mxu1 %v2739_v47 }
 0x37b   :  { %v845_v56 = vpop.f32.mrf.mxu0  ;;  %v916_v62 = vpop.f32.mrf.mxu1 }
 0x37c   :  { %v846_v20 = vadd.f32 %v845_v56, %v3548_v59  ;;  %v917_v2 = vadd.f32 %v916_v62, %v296_v5  ;;  %v2786_v56 = vld [vmem:[#allocation4 + $0x1a0] sm:$0xff]  ;;  %v2792_v59 = vld [vmem:[#allocation4 + $0x188] sm:$0xff]  ;;  %v2825_v5 = vld [vmem:[#allocation4 + $0x150] sm:$0xff] }
 0x37d   :  { %v847_v1 = vpop.f32.mrf.mxu0  ;;  %v918_v10 = vpop.f32.mrf.mxu1  ;;  %v2822_v62 = vld [vmem:[#allocation4 + $0x140] sm:$0xff] }
 0x37e   :  { %v1831_v61 = vmul.f32 -1.442695, %v846_v20  ;;  %v848_v60 = vadd.f32 %v847_v1, %v295_v23  ;;  %v1833_v12 = vmul.f32 -1.442695, %v917_v2  ;;  %v919_v16 = vadd.f32 %v918_v10, %v297_v7  ;;  %v2795_v20 = vld [vmem:[#allocation4 + $0x198] sm:$0xff]  ;;  %v2798_v23 = vld [vmem:[#allocation4 + $0x180] sm:$0xff] }
 0x37f   :  { %v2801_v1 = vld [vmem:[#allocation4 + $0x190] sm:$0xff]  ;;  %v2831_v2 = vld [vmem:[#allocation4 + $0x138] sm:$0xff]  ;;  %v2840_v7 = vld [vmem:[#allocation4 + $0x108] sm:$0xff] }
 0x380   :  { %1906 = vpow2.f32 %v1831_v61  ;;  %v1832_v17 = vmul.f32 -1.442695, %v848_v60  ;;  %v2804_v61 = vld [vmem:[#allocation4 + $0x168] sm:$0xff]  ;;  %v2807_v60 = vld [vmem:[#allocation4 + $0x178] sm:$0xff]  ;;  %v2837_v10 = vld [vmem:[#allocation4 + $0x130] sm:$0xff] }
 0x382   :  { %1908 = vpow2.f32 %v1832_v17  ;;  %v2813_v17 = vld [vmem:[#allocation4 + $0x170] sm:$0xff] }
 0x383   :  { %1910 = vpow2.f32 %v1833_v12  ;;  %v2843_v12 = vld [vmem:[#allocation4 + $0x118] sm:$0xff] }
 0x384   :  { %1912 = vtanh.f32 %v919_v16  ;;  %v2846_v16 = vld [vmem:[#allocation4 + $0x100] sm:$0xff] }
 0x38d   :  { %v1907_v15 = vpop.eup %1906 }
 0x38e   :  { %v930_v9 = vadd.f32 1.0, %v1907_v15  ;;  %v2849_v15 = vld [vmem:[#allocation4 + $0x110] sm:$0xff] }
 0x38f   :  { %v1909_v21 = vpop.eup %1908 }
 0x390   :  { %1914 = vrcp.f32 %v930_v9  ;;  %v931_v22 = vadd.f32 1.0, %v1909_v21  ;;  %v1911_v24 = vpop.eup %1910  ;;  %v2852_v9 = vld [vmem:[#allocation4 + $0xe8] sm:$0xff]  ;;  %v2855_v21 = vld [vmem:[#allocation4 + $0xf8] sm:$0xff] }
 0x391   :  { %v1913_v25 = vpop.eup %1912  ;;  %v932_v29 = vadd.f32 1.0, %v1911_v24  ;;  %v2861_v24 = vld [vmem:[#allocation4 + $0xf0] sm:$0xff] }
 0x392   :  { %1916 = vrcp.f32 %v931_v22  ;;  %v2858_v22 = vld [vmem:[#allocation4 + $0xe0] sm:$0xff] }
 0x393   :  { %1918 = vrcp.f32 %v932_v29  ;;  %v2876_v29 = vld [vmem:[#allocation4 + $0xa8] sm:$0xff] }
 0x394   :  { %3550 = vst [vmem:[#allocation40_spill] sm:$0xff] %v2876_v29 }
 0x39d   :  { %v1915_v26 = vpop.eup %1914 }
 0x39e   :  { %v941_v27 = vmul.f32 %v1915_v26, %v1913_v25  ;;  %v2864_v25 = vld [vmem:[#allocation4 + $0xc8] sm:$0xff]  ;;  %v2867_v26 = vld [vmem:[#allocation4 + $0xd8] sm:$0xff] }
 0x39f   :  { %v1917_v28 = vpop.eup %1916 }
 0x3a0   :  { %v940_v30 = vmul.f32 %v1917_v28, %v2669_v3  ;;  %v1919_v32 = vpop.eup %1918  ;;  %v2771_v3 = vld [vmem:[#allocation4 + $0x1d8] sm:$0xff]  ;;  %v2873_v28 = vld [vmem:[#allocation4 + $0xd0] sm:$0xff] }
 0x3a1   :  { %3549 = vst [vmem:[#allocation38_spill] sm:$0xff] %v2873_v28 }
 0x3a2   :  { %v2759_v31 = vadd.f32 %v941_v27, %v940_v30  ;;  %v2870_v27 = vld [vmem:[#allocation4 + $0xc0] sm:$0xff]  ;;  %v2879_v30 = vld [vmem:[#allocation4 + $0xb8] sm:$0xff] }
 0x3a3   :  { %3551 = vst [vmem:[#allocation41_spill] sm:$0xff] %v2879_v30 }
 0x3a4   :  { %1920 = vtanh.f32 %v2759_v31 }
 0x3b1   :  { %v1921_v33 = vpop.eup %1920 }
 0x3b2   :  { %v944_v34 = vmul.f32 %v1921_v33, %v1919_v32  ;;  %v2882_v32 = vld [vmem:[#allocation4 + $0xa0] sm:$0xff]  ;;  %v2885_v33 = vld [vmem:[#allocation4 + $0xb0] sm:$0xff] }
 0x3b3   :  { %3552 = vst [vmem:[#allocation10_spill] sm:$0xff] %v2882_v32  ;;  %3553 = vst [vmem:[#allocation11_spill] sm:$0xff] %v2885_v33 }
 0x3b4   :  { %1015 = vmatmul.mubr.f32.vlgmr.msra.gmra.mxu0 %v944_v34  ;;  %1086 = vmatmul.mubr.f32.vlgmr.msra.gmra.mxu1 %v944_v34  ;;  %v2888_v34 = vld [vmem:[#allocation4 + $0x88] sm:$0xff] }
 0x3b5   :  { %1122 = vmatpush1.msra.mxu0 %v2762_v35  ;;  %1193 = vmatpush1.msra.mxu1 %v2765_v36  ;;  %3554 = vst [vmem:[#allocation43_spill] sm:$0xff] %v2888_v34 }
 0x3b6   :  { %1123 = vmatprep.subr.mxu0 %v2768_v48  ;;  %1194 = vmatprep.subr.mxu1 %v2771_v3 }
 0x3b7   :  { %1124 = vmatpush1.msra.mxu0 %v2774_v50  ;;  %1195 = vmatpush1.msra.mxu1 %v2777_v52 }
 0x3b8   :  { %1125 = vmatprep.subr.mxu0 %v2780_v53  ;;  %1196 = vmatprep.subr.mxu1 %v2783_v55 }
 0x3b9   :  { %1126 = vmatpush1.msra.mxu0 %v2786_v56  ;;  %1197 = vmatpush1.msra.mxu1 %v2789_v58 }
 0x3ba   :  { %1127 = vmatprep.subr.mxu0 %v2792_v59  ;;  %1198 = vmatprep.subr.mxu1 %v2795_v20 }
 0x3bb   :  { %1128 = vmatpush1.msra.mxu0 %v2798_v23  ;;  %1199 = vmatpush1.msra.mxu1 %v2801_v1 }
 0x3bc   :  { %1129 = vmatprep.subr.mxu0 %v2804_v61  ;;  %1200 = vmatprep.subr.mxu1 %v2807_v60 }
 0x3bd   :  { %1130 = vmatpush1.msra.mxu0 %v2810_v14  ;;  %1201 = vmatpush1.msra.mxu1 %v2813_v17 }
 0x3be   :  { %1131 = vmatprep.subr.mxu0 %v2816_v19  ;;  %1202 = vmatprep.subr.mxu1 %v2819_v11 }
 0x3bf   :  { %1132 = vmatpush1.msra.mxu0 %v2822_v62  ;;  %1203 = vmatpush1.msra.mxu1 %v2825_v5 }
 0x3c0   :  { %1133 = vmatprep.subr.mxu0 %v2828_v18  ;;  %1204 = vmatprep.subr.mxu1 %v2831_v2 }
 0x3c1   :  { %1134 = vmatpush1.msra.mxu0 %v2834_v13  ;;  %1205 = vmatpush1.msra.mxu1 %v2837_v10 }
 0x3c2   :  { %1135 = vmatprep.subr.mxu0 %v2840_v7  ;;  %1206 = vmatprep.subr.mxu1 %v2843_v12 }
 0x3c3   :  { %1136 = vmatpush1.msra.mxu0 %v2846_v16  ;;  %1207 = vmatpush1.msra.mxu1 %v2849_v15 }
 0x3c4   :  { %1137 = vmatprep.subr.mxu0 %v2852_v9  ;;  %1208 = vmatprep.subr.mxu1 %v2855_v21 }
 0x3c5   :  { %1138 = vmatpush1.msra.mxu0 %v2858_v22  ;;  %1209 = vmatpush1.msra.mxu1 %v2861_v24 }
 0x3c6   :  { %1139 = vmatprep.subr.mxu0 %v2864_v25  ;;  %1210 = vmatprep.subr.mxu1 %v2867_v26 }
 0x3c7   :  { %1140 = vmatpush1.msra.mxu0 %v2870_v27  ;;  %1211 = vmatpush1.msra.mxu1 %v2873_v28  ;;  %v2891_v28 = vld [vmem:[#allocation4 + $0x98] sm:$0xff] }
 0x3c8   :  { %1141 = vmatprep.subr.mxu0 %v2876_v29  ;;  %1212 = vmatprep.subr.mxu1 %v2879_v30  ;;  %3555 = vst [vmem:[#allocation42_spill] sm:$0xff] %v2891_v28  ;;  %v2894_v29 = vld [vmem:[#allocation4 + $0x80] sm:$0xff]  ;;  %v2897_v30 = vld [vmem:[#allocation4 + $0x90] sm:$0xff] }
 0x3c9   :  { %1142 = vmatpush1.msra.mxu0 %v2882_v32  ;;  %1213 = vmatpush1.msra.mxu1 %v2885_v33  ;;  %3556 = vst [vmem:[#allocation46_spill] sm:$0xff] %v2894_v29  ;;  %3557 = vst [vmem:[#allocation39_spill] sm:$0xff] %v2897_v30  ;;  %v2900_v32 = vld [vmem:[#allocation4 + $0x68] sm:$0xff]  ;;  %v2903_v33 = vld [vmem:[#allocation4 + $0x78] sm:$0xff] }
 0x3ca   :  { %1143 = vmatprep.subr.mxu0 %v2888_v34  ;;  %1214 = vmatprep.subr.mxu1 %v2891_v28  ;;  %3558 = vst [vmem:[#allocation13_spill] sm:$0xff] %v2900_v32  ;;  %3559 = vst [vmem:[#allocation14_spill] sm:$0xff] %v2903_v33  ;;  %v2906_v34 = vld [vmem:[#allocation4 + $0x60] sm:$0xff]  ;;  %v2909_v28 = vld [vmem:[#allocation4 + $0x70] sm:$0xff] }
 0x3cb   :  { %1144 = vmatpush1.msra.mxu0 %v2894_v29  ;;  %1215 = vmatpush1.msra.mxu1 %v2897_v30  ;;  %3560 = vst [vmem:[#allocation15_spill] sm:$0xff] %v2906_v34  ;;  %3561 = vst [vmem:[#allocation16_spill] sm:$0xff] %v2909_v28  ;;  %v2912_v29 = vld [vmem:[#allocation4 + $0x48] sm:$0xff]  ;;  %v2915_v30 = vld [vmem:[#allocation4 + $0x58] sm:$0xff] }
 0x3cc   :  { %1145 = vmatprep.subr.mxu0 %v2900_v32  ;;  %1216 = vmatprep.subr.mxu1 %v2903_v33  ;;  %3562 = vst [vmem:[#allocation17_spill] sm:$0xff] %v2912_v29  ;;  %3563 = vst [vmem:[#allocation18_spill] sm:$0xff] %v2915_v30  ;;  %v2918_v32 = vld [vmem:[#allocation4 + $0x40] sm:$0xff]  ;;  %v2921_v33 = vld [vmem:[#allocation4 + $0x50] sm:$0xff] }
 0x3cd   :  { %1146 = vmatpush1.msra.mxu0 %v2906_v34  ;;  %1217 = vmatpush1.msra.mxu1 %v2909_v28  ;;  %3564 = vst [vmem:[#allocation19_spill] sm:$0xff] %v2918_v32  ;;  %3565 = vst [vmem:[#allocation20_spill] sm:$0xff] %v2921_v33 }
 0x3ce   :  { %1147 = vmatprep.subr.mxu0 %v2912_v29  ;;  %1218 = vmatprep.subr.mxu1 %v2915_v30 }
 0x3cf   :  { %1148 = vmatpush1.msra.mxu0 %v2918_v32  ;;  %1219 = vmatpush1.msra.mxu1 %v2921_v33  ;;  %v3568_v33 = vld [vmem:[#allocation52_spill] sm:$0xff] }
 0x3d0   :  { %1149 = vmatprep.subr.mxu0 %v3531_v37  ;;  %1220 = vmatprep.subr.mxu1 %v3532_v38  ;;  %v3566_v37 = vld [vmem:[#allocation48_spill] sm:$0xff] }
 0x3d1   :  { %1150 = vmatpush1.msra.mxu0 %v3533_v39  ;;  %1221 = vmatpush1.msra.mxu1 %v3534_v40  ;;  %v148_v38 = vmul.f32 %v3543_v49, %v3566_v37  ;;  %v3567_v40 = vld [vmem:[#allocation47_spill] sm:$0xff] }
 0x3d2   :  { %1151 = vmatprep.subr.mxu0 %v3535_v41  ;;  %1222 = vmatprep.subr.mxu1 %v3536_v42  ;;  %v267_v41 = vmul.f32 %v3546_v54, %v3567_v40  ;;  %v268_v54 = vmul.f32 %v3515_v0, %v3567_v40 }
 0x3d3   :  { %1152 = vmatpush1.msra.mxu0 %v3537_v43  ;;  %1185 = vmatprep.mubr.f32.mxu0 %v3538_v44  ;;  %v180_v39 = vadd.f32 %v148_v38, %v3544_v51  ;;  %v149_v43 = vmul.f32 %v3547_v57, %v3566_v37  ;;  %v150_v38 = vmul.f32 %v2426_v4, %v3566_v37 }
 0x3d4   :  { %1223 = vmatpush1.msra.mxu1 %v3539_v45  ;;  %1256 = vmatprep.mubr.f32.mxu1 %v3538_v44 }
 0x3d5   :  { %1292 = vmatprep.subr.mxu0 %v2736_v46  ;;  %1363 = vmatprep.subr.mxu1 %v2739_v47  ;;  %v299_v32 = vadd.f32 %v267_v41, %v180_v39  ;;  %v181_v47 = vadd.f32 %v149_v43, %v3480_v6  ;;  %v182_v57 = vadd.f32 %v150_v38, %v2444_v63 }
 0x3d6   :  { %v269_v39 = vmul.f32 %v2437_v8, %v3567_v40 }
 0x3d7   :  { %v300_v49 = vadd.f32 %v268_v54, %v181_v47 }
 0x474   :  { %v1016_v42 = vpop.f32.mrf.mxu0  ;;  %v1087_v51 = vpop.f32.mrf.mxu1 }
 0x475   :  { %v1017_v45 = vadd.f32 %v1016_v42, %v3568_v33  ;;  %v1088_v33 = vadd.f32 %v1087_v51, %v300_v49 }
 0x476   :  { %v1018_v44 = vpop.f32.mrf.mxu0 }
 0x477   :  { %v1834_v30 = vmul.f32 -1.442695, %v1017_v45  ;;  %v1019_v46 = vadd.f32 %v1018_v44, %v299_v32  ;;  %v1089_v44 = vpop.f32.mrf.mxu1  ;;  %v1836_v32 = vmul.f32 -1.442695, %v1088_v33 }
 0x479   :  { %1922 = vpow2.f32 %v1834_v30  ;;  %v1835_v29 = vmul.f32 -1.442695, %v1019_v46  ;;  %v301_v30 = vadd.f32 %v269_v39, %v182_v57 }
 0x47b   :  { %1924 = vpow2.f32 %v1835_v29  ;;  %v1090_v41 = vadd.f32 %v1089_v44, %v301_v30  ;;  %v3570_v44 = vld [vmem:[#allocation40_spill] sm:$0xff]  ;;  %v3571_v30 = vld [vmem:[#allocation41_spill] sm:$0xff] }
 0x47c   :  { %1926 = vpow2.f32 %v1836_v32  ;;  %v3572_v32 = vld [vmem:[#allocation10_spill] sm:$0xff] }
 0x47d   :  { %1928 = vtanh.f32 %v1090_v41  ;;  %v3573_v41 = vld [vmem:[#allocation11_spill] sm:$0xff] }
 0x486   :  { %v1923_v46 = vpop.eup %1922 }
 0x487   :  { %v1101_v42 = vadd.f32 1.0, %v1923_v46  ;;  %v3574_v46 = vld [vmem:[#allocation43_spill] sm:$0xff] }
 0x488   :  { %v1925_v37 = vpop.eup %1924 }
 0x489   :  { %1930 = vrcp.f32 %v1101_v42  ;;  %v1102_v43 = vadd.f32 1.0, %v1925_v37  ;;  %v1927_v29 = vpop.eup %1926  ;;  %v3575_v42 = vld [vmem:[#allocation42_spill] sm:$0xff] }
 0x48a   :  { %v1929_v47 = vpop.eup %1928  ;;  %v1103_v51 = vadd.f32 1.0, %v1927_v29  ;;  %v3576_v37 = vld [vmem:[#allocation46_spill] sm:$0xff]  ;;  %v3578_v29 = vld [vmem:[#allocation13_spill] sm:$0xff] }
 0x48b   :  { %1932 = vrcp.f32 %v1102_v43  ;;  %v3577_v43 = vld [vmem:[#allocation39_spill] sm:$0xff] }
 0x48c   :  { %1934 = vrcp.f32 %v1103_v51  ;;  %v3583_v51 = vld [vmem:[#allocation20_spill] sm:$0xff] }
 0x496   :  { %v1931_v54 = vpop.eup %1930 }
 0x497   :  { %v1112_v45 = vmul.f32 %v1931_v54, %v1929_v47  ;;  %v3579_v47 = vld [vmem:[#allocation14_spill] sm:$0xff]  ;;  %v3580_v54 = vld [vmem:[#allocation17_spill] sm:$0xff] }
 0x498   :  { %v1933_v49 = vpop.eup %1932 }
 0x499   :  { %v1111_v40 = vmul.f32 %v1933_v49, %v2759_v31  ;;  %v1935_v57 = vpop.eup %1934  ;;  %v3569_v31 = vld [vmem:[#allocation38_spill] sm:$0xff]  ;;  %v3582_v49 = vld [vmem:[#allocation19_spill] sm:$0xff] }
 0x49b   :  { %v2953_v38 = vadd.f32 %v1112_v45, %v1111_v40  ;;  %v3581_v45 = vld [vmem:[#allocation18_spill] sm:$0xff]  ;;  %v3010_v40 = vld [vmem:[#allocation4 + $0x28] sm:$0xff] }
 0x49c   :  { %3584 = vst [vmem:[#allocation21_spill] sm:$0xff] %v3010_v40 }
 0x49d   :  { %1936 = vtanh.f32 %v2953_v38 }
 0x4aa   :  { %v1937_v33 = vpop.eup %1936 }
 0x4ab   :  { %v1115_v39 = vmul.f32 %v1937_v33, %v1935_v57  ;;  %v3013_v57 = vld [vmem:[#allocation4 + $0x38] sm:$0xff]  ;;  %v3016_v33 = vld [vmem:[#allocation4 + $0x20] sm:$0xff] }
 0x4ac   :  { %3585 = vst [vmem:[#allocation22_spill] sm:$0xff] %v3013_v57  ;;  %3586 = vst [vmem:[#allocation23_spill] sm:$0xff] %v3016_v33 }
 0x4ad   :  { %1186 = vmatmul.mubr.f32.vlgmr.msra.gmra.mxu0 %v1115_v39  ;;  %1257 = vmatmul.mubr.f32.vlgmr.msra.gmra.mxu1 %v1115_v39  ;;  %v3019_v39 = vld [vmem:[#allocation4 + $0x30] sm:$0xff] }
 0x4ae   :  { %1293 = vmatpush1.msra.mxu0 %v2762_v35  ;;  %1364 = vmatpush1.msra.mxu1 %v2765_v36  ;;  %3587 = vst [vmem:[#allocation24_spill] sm:$0xff] %v3019_v39 }
 0x4af   :  { %1294 = vmatprep.subr.mxu0 %v2768_v48  ;;  %1365 = vmatprep.subr.mxu1 %v2771_v3 }
 0x4b0   :  { %1295 = vmatpush1.msra.mxu0 %v2774_v50  ;;  %1366 = vmatpush1.msra.mxu1 %v2777_v52 }
 0x4b1   :  { %1296 = vmatprep.subr.mxu0 %v2780_v53  ;;  %1367 = vmatprep.subr.mxu1 %v2783_v55 }
 0x4b2   :  { %1297 = vmatpush1.msra.mxu0 %v2786_v56  ;;  %1368 = vmatpush1.msra.mxu1 %v2789_v58 }
 0x4b3   :  { %1298 = vmatprep.subr.mxu0 %v2792_v59  ;;  %1369 = vmatprep.subr.mxu1 %v2795_v20 }
 0x4b4   :  { %1299 = vmatpush1.msra.mxu0 %v2798_v23  ;;  %1370 = vmatpush1.msra.mxu1 %v2801_v1 }
 0x4b5   :  { %1300 = vmatprep.subr.mxu0 %v2804_v61  ;;  %1371 = vmatprep.subr.mxu1 %v2807_v60 }
 0x4b6   :  { %1301 = vmatpush1.msra.mxu0 %v2810_v14  ;;  %1372 = vmatpush1.msra.mxu1 %v2813_v17 }
 0x4b7   :  { %1302 = vmatprep.subr.mxu0 %v2816_v19  ;;  %1373 = vmatprep.subr.mxu1 %v2819_v11 }
 0x4b8   :  { %1303 = vmatpush1.msra.mxu0 %v2822_v62  ;;  %1374 = vmatpush1.msra.mxu1 %v2825_v5 }
 0x4b9   :  { %1304 = vmatprep.subr.mxu0 %v2828_v18  ;;  %1375 = vmatprep.subr.mxu1 %v2831_v2 }
 0x4ba   :  { %1305 = vmatpush1.msra.mxu0 %v2834_v13  ;;  %1376 = vmatpush1.msra.mxu1 %v2837_v10 }
 0x4bb   :  { %1306 = vmatprep.subr.mxu0 %v2840_v7  ;;  %1377 = vmatprep.subr.mxu1 %v2843_v12 }
 0x4bc   :  { %1307 = vmatpush1.msra.mxu0 %v2846_v16  ;;  %1378 = vmatpush1.msra.mxu1 %v2849_v15 }
 0x4bd   :  { %1308 = vmatprep.subr.mxu0 %v2852_v9  ;;  %1379 = vmatprep.subr.mxu1 %v2855_v21 }
 0x4be   :  { %1309 = vmatpush1.msra.mxu0 %v2858_v22  ;;  %1380 = vmatpush1.msra.mxu1 %v2861_v24 }
 0x4bf   :  { %1310 = vmatprep.subr.mxu0 %v2864_v25  ;;  %1381 = vmatprep.subr.mxu1 %v2867_v26 }
 0x4c0   :  { %1311 = vmatpush1.msra.mxu0 %v2870_v27  ;;  %1382 = vmatpush1.msra.mxu1 %v3569_v31 }
 0x4c1   :  { %1312 = vmatprep.subr.mxu0 %v3570_v44  ;;  %1383 = vmatprep.subr.mxu1 %v3571_v30 }
 0x4c2   :  { %1313 = vmatpush1.msra.mxu0 %v3572_v32  ;;  %1384 = vmatpush1.msra.mxu1 %v3573_v41 }
 0x4c3   :  { %1314 = vmatprep.subr.mxu0 %v3574_v46  ;;  %1385 = vmatprep.subr.mxu1 %v3575_v42  ;;  %v3601_v46 = vld [vmem:[#allocation55_spill] sm:$0xff] }
 0x4c4   :  { %1315 = vmatpush1.msra.mxu0 %v3576_v37  ;;  %1386 = vmatpush1.msra.mxu1 %v3577_v43  ;;  %v3600_v37 = vld [vmem:[#allocation37_spill] sm:$0xff] }
 0x4c5   :  { %1316 = vmatprep.subr.mxu0 %v3578_v29  ;;  %1387 = vmatprep.subr.mxu1 %v3579_v47  ;;  %v3598_v47 = vld [vmem:[#allocation50_spill] sm:$0xff]  ;;  %v3599_v29 = vld [vmem:[#allocation8_spill] sm:$0xff] }
 0x4c6   :  { %1317 = vmatpush1.msra.mxu0 %v2906_v34  ;;  %1388 = vmatpush1.msra.mxu1 %v2909_v28 }
 0x4c7   :  { %1318 = vmatprep.subr.mxu0 %v3580_v54  ;;  %1389 = vmatprep.subr.mxu1 %v3581_v45  ;;  %v3022_v45 = vld [vmem:[#allocation4 + $0x8] sm:$0xff]  ;;  %v3596_v54 = vld [vmem:[#allocation7_spill] sm:$0xff] }
 0x4c8   :  { %1319 = vmatpush1.msra.mxu0 %v3582_v49  ;;  %1390 = vmatpush1.msra.mxu1 %v3583_v51  ;;  %3588 = vst [vmem:[#allocation25_spill] sm:$0xff] %v3022_v45  ;;  %v3025_v51 = vld [vmem:[#allocation4 + $0x18] sm:$0xff]  ;;  %v3032_v49 = vld [vmem:[#allocation4 + $0x10] sm:$0xff] }
 0x4c9   :  { %1320 = vmatprep.subr.mxu0 %v3010_v40  ;;  %1391 = vmatprep.subr.mxu1 %v3013_v57  ;;  %3589 = vst [vmem:[#allocation26_spill] sm:$0xff] %v3025_v51  ;;  %v3028_v40 = vld [vmem:[#allocation4] sm:$0xff]  ;;  %v3591_v57 = vmov 0.0   ;;  %3592 = vst [vmem:[#allocation28_spill] sm:$0xff] %v3032_v49 }
 0x4ca   :  { %1321 = vmatpush1.msra.mxu0 %v3016_v33  ;;  %1392 = vmatpush1.msra.mxu1 %v3019_v39  ;;  %3590 = vst [vmem:[#allocation27_spill] sm:$0xff] %v3028_v40  ;;  %v3593_v39 = vld [vmem:[#allocation12_spill] sm:$0xff] }
 0x4cb   :  { %1322 = vmatprep.subr.mxu0 %v3022_v45  ;;  %1393 = vmatprep.subr.mxu1 %v3025_v51  ;;  %v3594_v33 = vld [vmem:[#allocation36_spill] sm:$0xff]  ;;  %v3595_v45 = vld [vmem:[#allocation51_spill] sm:$0xff]  ;;  %v3597_v51 = vld [vmem:[#allocation9_spill] sm:$0xff] }
 0x4cc   :  { %1323 = vmatpush1.msra.mxu0 %v3028_v40  ;;  %1356 = vmatprep.mubr.f32.mxu0 %v3591_v57  ;;  %v152_v28 = vmul.f32 %v3596_v54, %v3595_v45  ;;  %v271_v40 = vmul.f32 %v3599_v29, %v3598_v47  ;;  %v153_v42 = vmul.f32 %v3600_v37, %v3595_v45 }
 0x4cd   :  { %1394 = vmatpush1.msra.mxu1 %v3032_v49  ;;  %1427 = vmatprep.mubr.f32.mxu1 %v3591_v57  ;;  %v272_v29 = vmul.f32 %v3515_v0, %v3598_v47 }
 0x4ce   :  { %1463 = vmatprep.subr.mxu0 %v3593_v39  ;;  %1534 = vmatprep.subr.mxu1 %v3594_v33  ;;  %v184_v34 = vadd.f32 %v152_v28, %v3597_v51  ;;  %v185_v33 = vadd.f32 %v153_v42, %v3480_v6  ;;  %v154_v28 = vmul.f32 %v2426_v4, %v3595_v45 }
 0x4d0   :  { %v303_v41 = vadd.f32 %v271_v40, %v184_v34  ;;  %v304_v54 = vadd.f32 %v272_v29, %v185_v33  ;;  %v186_v37 = vadd.f32 %v154_v28, %v2444_v63  ;;  %v273_v34 = vmul.f32 %v2437_v8, %v3598_v47 }
 0x56d   :  { %v1187_v43 = vpop.f32.mrf.mxu0  ;;  %v1258_v51 = vpop.f32.mrf.mxu1 }
 0x56e   :  { %v1188_v49 = vadd.f32 %v1187_v43, %v3601_v46  ;;  %v1259_v46 = vadd.f32 %v1258_v51, %v304_v54 }
 0x56f   :  { %v1189_v57 = vpop.f32.mrf.mxu0 }
 0x570   :  { %v1837_v32 = vmul.f32 -1.442695, %v1188_v49  ;;  %v1190_v39 = vadd.f32 %v1189_v57, %v303_v41  ;;  %v1260_v41 = vpop.f32.mrf.mxu1  ;;  %v1839_v43 = vmul.f32 -1.442695, %v1259_v46 }
 0x572   :  { %1938 = vpow2.f32 %v1837_v32  ;;  %v1838_v30 = vmul.f32 -1.442695, %v1190_v39  ;;  %v305_v32 = vadd.f32 %v273_v34, %v186_v37 }
 0x574   :  { %1940 = vpow2.f32 %v1838_v30  ;;  %v1261_v42 = vadd.f32 %v1260_v41, %v305_v32  ;;  %v3603_v41 = vld [vmem:[#allocation10_spill] sm:$0xff]  ;;  %v3604_v32 = vld [vmem:[#allocation11_spill] sm:$0xff] }
 0x575   :  { %1942 = vpow2.f32 %v1839_v43  ;;  %v3605_v43 = vld [vmem:[#allocation43_spill] sm:$0xff] }
 0x576   :  { %1944 = vtanh.f32 %v1261_v42  ;;  %v3606_v42 = vld [vmem:[#allocation42_spill] sm:$0xff] }
 0x57f   :  { %v1939_v49 = vpop.eup %1938 }
 0x580   :  { %v1272_v40 = vadd.f32 1.0, %v1939_v49  ;;  %v3607_v49 = vld [vmem:[#allocation46_spill] sm:$0xff] }
 0x581   :  { %v1941_v45 = vpop.eup %1940 }
 0x582   :  { %1946 = vrcp.f32 %v1272_v40  ;;  %v1273_v57 = vadd.f32 1.0, %v1941_v45  ;;  %v1943_v30 = vpop.eup %1942  ;;  %v3608_v40 = vld [vmem:[#allocation39_spill] sm:$0xff]  ;;  %v3609_v45 = vld [vmem:[#allocation13_spill] sm:$0xff] }
 0x583   :  { %v1945_v29 = vpop.eup %1944  ;;  %v1274_v51 = vadd.f32 1.0, %v1943_v30  ;;  %v3611_v30 = vld [vmem:[#allocation15_spill] sm:$0xff] }
 0x584   :  { %1948 = vrcp.f32 %v1273_v57  ;;  %v3610_v57 = vld [vmem:[#allocation14_spill] sm:$0xff] }
 0x585   :  { %1950 = vrcp.f32 %v1274_v51  ;;  %v3616_v51 = vld [vmem:[#allocation20_spill] sm:$0xff] }
 0x58f   :  { %v1947_v33 = vpop.eup %1946 }
 0x590   :  { %v1283_v39 = vmul.f32 %v1947_v33, %v1945_v29  ;;  %v3612_v29 = vld [vmem:[#allocation16_spill] sm:$0xff]  ;;  %v3613_v33 = vld [vmem:[#allocation17_spill] sm:$0xff] }
 0x591   :  { %v1949_v54 = vpop.eup %1948 }
 0x592   :  { %v1282_v47 = vmul.f32 %v1949_v54, %v2953_v38  ;;  %v1951_v37 = vpop.eup %1950  ;;  %v3602_v38 = vld [vmem:[#allocation41_spill] sm:$0xff]  ;;  %v3615_v54 = vld [vmem:[#allocation19_spill] sm:$0xff] }
 0x594   :  { %v3055_v28 = vadd.f32 %v1283_v39, %v1282_v47  ;;  %v3614_v39 = vld [vmem:[#allocation18_spill] sm:$0xff]  ;;  %v3617_v47 = vld [vmem:[#allocation21_spill] sm:$0xff] }
 0x596   :  { %1952 = vtanh.f32 %v3055_v28 }
 0x5a3   :  { %v1953_v46 = vpop.eup %1952 }
 0x5a4   :  { %v1286_v34 = vmul.f32 %v1953_v46, %v1951_v37  ;;  %v3618_v37 = vld [vmem:[#allocation22_spill] sm:$0xff]  ;;  %v3619_v46 = vld [vmem:[#allocation23_spill] sm:$0xff] }
 0x5a6   :  { %1357 = vmatmul.mubr.f32.vlgmr.msra.gmra.mxu0 %v1286_v34  ;;  %1428 = vmatmul.mubr.f32.vlgmr.msra.gmra.mxu1 %v1286_v34  ;;  %v3620_v34 = vld [vmem:[#allocation24_spill] sm:$0xff] }
 0x5a7   :  { %1464 = vmatpush1.msra.mxu0 %v2762_v35  ;;  %1535 = vmatpush1.msra.mxu1 %v2765_v36 }
 0x5a8   :  { %1465 = vmatprep.subr.mxu0 %v2768_v48  ;;  %1536 = vmatprep.subr.mxu1 %v2771_v3 }
 0x5a9   :  { %1466 = vmatpush1.msra.mxu0 %v2774_v50  ;;  %1537 = vmatpush1.msra.mxu1 %v2777_v52 }
 0x5aa   :  { %1467 = vmatprep.subr.mxu0 %v2780_v53  ;;  %1538 = vmatprep.subr.mxu1 %v2783_v55 }
 0x5ab   :  { %1468 = vmatpush1.msra.mxu0 %v2786_v56  ;;  %1539 = vmatpush1.msra.mxu1 %v2789_v58 }
 0x5ac   :  { %1469 = vmatprep.subr.mxu0 %v2792_v59  ;;  %1540 = vmatprep.subr.mxu1 %v2795_v20 }
 0x5ad   :  { %1470 = vmatpush1.msra.mxu0 %v2798_v23  ;;  %1541 = vmatpush1.msra.mxu1 %v2801_v1 }
 0x5ae   :  { %1471 = vmatprep.subr.mxu0 %v2804_v61  ;;  %1542 = vmatprep.subr.mxu1 %v2807_v60 }
 0x5af   :  { %1472 = vmatpush1.msra.mxu0 %v2810_v14  ;;  %1543 = vmatpush1.msra.mxu1 %v2813_v17 }
 0x5b0   :  { %1473 = vmatprep.subr.mxu0 %v2816_v19  ;;  %1544 = vmatprep.subr.mxu1 %v2819_v11 }
 0x5b1   :  { %1474 = vmatpush1.msra.mxu0 %v2822_v62  ;;  %1545 = vmatpush1.msra.mxu1 %v2825_v5 }
 0x5b2   :  { %1475 = vmatprep.subr.mxu0 %v2828_v18  ;;  %1546 = vmatprep.subr.mxu1 %v2831_v2 }
 0x5b3   :  { %1476 = vmatpush1.msra.mxu0 %v2834_v13  ;;  %1547 = vmatpush1.msra.mxu1 %v2837_v10 }
 0x5b4   :  { %1477 = vmatprep.subr.mxu0 %v2840_v7  ;;  %1548 = vmatprep.subr.mxu1 %v2843_v12 }
 0x5b5   :  { %1478 = vmatpush1.msra.mxu0 %v2846_v16  ;;  %1549 = vmatpush1.msra.mxu1 %v2849_v15 }
 0x5b6   :  { %1479 = vmatprep.subr.mxu0 %v2852_v9  ;;  %1550 = vmatprep.subr.mxu1 %v2855_v21 }
 0x5b7   :  { %1480 = vmatpush1.msra.mxu0 %v2858_v22  ;;  %1551 = vmatpush1.msra.mxu1 %v2861_v24 }
 0x5b8   :  { %1481 = vmatprep.subr.mxu0 %v2864_v25  ;;  %1552 = vmatprep.subr.mxu1 %v2867_v26 }
 0x5b9   :  { %1482 = vmatpush1.msra.mxu0 %v2870_v27  ;;  %1553 = vmatpush1.msra.mxu1 %v3569_v31 }
 0x5ba   :  { %1483 = vmatprep.subr.mxu0 %v3570_v44  ;;  %1554 = vmatprep.subr.mxu1 %v3602_v38 }
 0x5bb   :  { %1484 = vmatpush1.msra.mxu0 %v3603_v41  ;;  %1555 = vmatpush1.msra.mxu1 %v3604_v32 }
 0x5bc   :  { %1485 = vmatprep.subr.mxu0 %v3605_v43  ;;  %1556 = vmatprep.subr.mxu1 %v3606_v42  ;;  %v3634_v43 = vld [vmem:[#allocation58_spill] sm:$0xff] }
 0x5bd   :  { %1486 = vmatpush1.msra.mxu0 %v3607_v49  ;;  %1557 = vmatpush1.msra.mxu1 %v3608_v40  ;;  %v3632_v40 = vld [vmem:[#allocation8_spill] sm:$0xff] }
 0x5be   :  { %1487 = vmatprep.subr.mxu0 %v3609_v45  ;;  %1558 = vmatprep.subr.mxu1 %v3610_v57  ;;  %v3621_v57 = vld [vmem:[#allocation25_spill] sm:$0xff] }
 0x5bf   :  { %1488 = vmatpush1.msra.mxu0 %v3611_v30  ;;  %1559 = vmatpush1.msra.mxu1 %v3612_v29  ;;  %v3622_v30 = vld [vmem:[#allocation26_spill] sm:$0xff]  ;;  %v3623_v29 = vld [vmem:[#allocation27_spill] sm:$0xff] }
 0x5c0   :  { %1489 = vmatprep.subr.mxu0 %v3613_v33  ;;  %1560 = vmatprep.subr.mxu1 %v3614_v39  ;;  %v3624_v33 = vmov 0.0   ;;  %v3625_v39 = vld [vmem:[#allocation28_spill] sm:$0xff] }
 0x5c1   :  { %1490 = vmatpush1.msra.mxu0 %v3615_v54  ;;  %1561 = vmatpush1.msra.mxu1 %v3616_v51  ;;  %v3626_v51 = vld [vmem:[#allocation12_spill] sm:$0xff] }
 0x5c2   :  { %1491 = vmatprep.subr.mxu0 %v3617_v47  ;;  %1562 = vmatprep.subr.mxu1 %v3618_v37  ;;  %v3627_v47 = vld [vmem:[#allocation36_spill] sm:$0xff]  ;;  %v3628_v37 = vld [vmem:[#allocation54_spill] sm:$0xff] }
 0x5c3   :  { %1492 = vmatpush1.msra.mxu0 %v3619_v46  ;;  %1563 = vmatpush1.msra.mxu1 %v3620_v34  ;;  %v3629_v46 = vld [vmem:[#allocation7_spill] sm:$0xff]  ;;  %v3630_v34 = vld [vmem:[#allocation9_spill] sm:$0xff] }
 0x5c4   :  { %1493 = vmatprep.subr.mxu0 %v3621_v57  ;;  %1564 = vmatprep.subr.mxu1 %v3622_v30  ;;  %v156_v54 = vmul.f32 %v3629_v46, %v3628_v37  ;;  %v3631_v57 = vld [vmem:[#allocation53_spill] sm:$0xff] }
 0x5c5   :  { %1494 = vmatpush1.msra.mxu0 %v3623_v29  ;;  %1527 = vmatprep.mubr.f32.mxu0 %v3624_v33  ;;  %v275_v30 = vmul.f32 %v3632_v40, %v3631_v57  ;;  %v3633_v29 = vld [vmem:[#allocation37_spill] sm:$0xff]  ;;  %v276_v40 = vmul.f32 %v3515_v0, %v3631_v57 }
 0x5c6   :  { %1565 = vmatpush1.msra.mxu1 %v3625_v39  ;;  %1598 = vmatprep.mubr.f32.mxu1 %v3624_v33  ;;  %v188_v45 = vadd.f32 %v156_v54, %v3630_v34  ;;  %v157_v42 = vmul.f32 %v3633_v29, %v3628_v37  ;;  %v158_v54 = vmul.f32 %v2426_v4, %v3628_v37 }
 0x5c7   :  { %1629 = vmatprep.subr.mxu0 %v3626_v51  ;;  %1700 = vmatprep.subr.mxu1 %v3627_v47 }
 0x5c8   :  { %v307_v32 = vadd.f32 %v275_v30, %v188_v45  ;;  %v189_v47 = vadd.f32 %v157_v42, %v3480_v6  ;;  %v190_v29 = vadd.f32 %v158_v54, %v2444_v63 }
 0x5ca   :  { %v308_v46 = vadd.f32 %v276_v40, %v189_v47 }
 0x666   :  { %v1358_v49 = vpop.f32.mrf.mxu0  ;;  %v1429_v34 = vpop.f32.mrf.mxu1 }
 0x667   :  { %v1359_v39 = vadd.f32 %v1358_v49, %v3634_v43  ;;  %v1430_v43 = vadd.f32 %v1429_v34, %v308_v46  ;;  %v277_v49 = vmul.f32 %v2437_v8, %v3631_v57 }
 0x668   :  { %v1360_v33 = vpop.f32.mrf.mxu0 }
 0x669   :  { %v1840_v41 = vmul.f32 -1.442695, %v1359_v39  ;;  %v1361_v51 = vadd.f32 %v1360_v33, %v307_v32  ;;  %v1431_v32 = vpop.f32.mrf.mxu1  ;;  %v1842_v45 = vmul.f32 -1.442695, %v1430_v43 }
 0x66b   :  { %1954 = vpow2.f32 %v1840_v41  ;;  %v1841_v38 = vmul.f32 -1.442695, %v1361_v51  ;;  %v309_v41 = vadd.f32 %v277_v49, %v190_v29 }
 0x66d   :  { %1956 = vpow2.f32 %v1841_v38  ;;  %v1432_v42 = vadd.f32 %v1431_v32, %v309_v41 }
 0x66e   :  { %1958 = vpow2.f32 %v1842_v45 }
 0x66f   :  { %1960 = vtanh.f32 %v1432_v42 }
 0x678   :  { %v1955_v30 = vpop.eup %1954 }
 0x679   :  { %v1443_v33 = vadd.f32 1.0, %v1955_v30 }
 0x67a   :  { %v1957_v39 = vpop.eup %1956 }
 0x67b   :  { %1962 = vrcp.f32 %v1443_v33  ;;  %v1444_v37 = vadd.f32 1.0, %v1957_v39  ;;  %v1959_v38 = vpop.eup %1958 }
 0x67c   :  { %v1961_v40 = vpop.eup %1960  ;;  %v1445_v34 = vadd.f32 1.0, %v1959_v38 }
 0x67d   :  { %1964 = vrcp.f32 %v1444_v37 }
 0x67e   :  { %1966 = vrcp.f32 %v1445_v34 }
 0x688   :  { %v1963_v51 = vpop.eup %1962 }
 0x689   :  { %v1454_v47 = vmul.f32 %v1963_v51, %v1961_v40 }
 0x68a   :  { %v1965_v46 = vpop.eup %1964 }
 0x68b   :  { %v1453_v57 = vmul.f32 %v1965_v46, %v3055_v28  ;;  %v1967_v29 = vpop.eup %1966 }
 0x68d   :  { %v3141_v54 = vadd.f32 %v1454_v47, %v1453_v57 }
 0x68f   :  { %1968 = vtanh.f32 %v3141_v54 }
 0x69c   :  { %v1969_v43 = vpop.eup %1968 }
 0x69d   :  { %v1457_v49 = vmul.f32 %v1969_v43, %v1967_v29 }
 0x69f   :  { %1528 = vmatmul.mubr.f32.vlgmr.msra.gmra.mxu0 %v1457_v49  ;;  %1599 = vmatmul.mubr.f32.vlgmr.msra.gmra.mxu1 %v1457_v49 }
 0x6a0   :  { %1630 = vmatpush1.msra.mxu0 %v2762_v35  ;;  %1701 = vmatpush1.msra.mxu1 %v2765_v36  ;;  %v3635_v35 = vld [vmem:[#allocation41_spill] sm:$0xff]  ;;  %v3636_v36 = vld [vmem:[#allocation10_spill] sm:$0xff] }
 0x6a1   :  { %1631 = vmatprep.subr.mxu0 %v2768_v48  ;;  %1702 = vmatprep.subr.mxu1 %v2771_v3  ;;  %v3637_v48 = vld [vmem:[#allocation11_spill] sm:$0xff] }
 0x6a2   :  { %1632 = vmatpush1.msra.mxu0 %v2774_v50  ;;  %1703 = vmatpush1.msra.mxu1 %v2777_v52  ;;  %v3638_v3 = vld [vmem:[#allocation43_spill] sm:$0xff]  ;;  %v3639_v50 = vld [vmem:[#allocation42_spill] sm:$0xff] }
 0x6a3   :  { %1633 = vmatprep.subr.mxu0 %v2780_v53  ;;  %1704 = vmatprep.subr.mxu1 %v2783_v55  ;;  %v3640_v52 = vld [vmem:[#allocation46_spill] sm:$0xff]  ;;  %v3641_v53 = vld [vmem:[#allocation39_spill] sm:$0xff]  ;;  %v3642_v55 = vld [vmem:[#allocation13_spill] sm:$0xff] }
 0x6a4   :  { %1634 = vmatpush1.msra.mxu0 %v2786_v56  ;;  %1705 = vmatpush1.msra.mxu1 %v2789_v58  ;;  %v3643_v56 = vld [vmem:[#allocation14_spill] sm:$0xff]  ;;  %v3644_v58 = vld [vmem:[#allocation15_spill] sm:$0xff] }
 0x6a5   :  { %1635 = vmatprep.subr.mxu0 %v2792_v59  ;;  %1706 = vmatprep.subr.mxu1 %v2795_v20  ;;  %v3645_v59 = vld [vmem:[#allocation16_spill] sm:$0xff]  ;;  %v3646_v20 = vld [vmem:[#allocation17_spill] sm:$0xff] }
 0x6a6   :  { %1636 = vmatpush1.msra.mxu0 %v2798_v23  ;;  %1707 = vmatpush1.msra.mxu1 %v2801_v1  ;;  %v3647_v23 = vld [vmem:[#allocation18_spill] sm:$0xff]  ;;  %v3648_v1 = vld [vmem:[#allocation19_spill] sm:$0xff] }
 0x6a7   :  { %1637 = vmatprep.subr.mxu0 %v2804_v61  ;;  %1708 = vmatprep.subr.mxu1 %v2807_v60  ;;  %v3649_v61 = vld [vmem:[#allocation20_spill] sm:$0xff]  ;;  %v3650_v60 = vld [vmem:[#allocation21_spill] sm:$0xff] }
 0x6a8   :  { %1638 = vmatpush1.msra.mxu0 %v2810_v14  ;;  %1709 = vmatpush1.msra.mxu1 %v2813_v17  ;;  %v3651_v14 = vld [vmem:[#allocation22_spill] sm:$0xff]  ;;  %v3652_v17 = vld [vmem:[#allocation23_spill] sm:$0xff] }
 0x6a9   :  { %1639 = vmatprep.subr.mxu0 %v2816_v19  ;;  %1710 = vmatprep.subr.mxu1 %v2819_v11  ;;  %v3653_v19 = vld [vmem:[#allocation24_spill] sm:$0xff]  ;;  %v3654_v11 = vld [vmem:[#allocation25_spill] sm:$0xff] }
 0x6aa   :  { %1640 = vmatpush1.msra.mxu0 %v2822_v62  ;;  %1711 = vmatpush1.msra.mxu1 %v2825_v5  ;;  %v3655_v62 = vld [vmem:[#allocation26_spill] sm:$0xff]  ;;  %v3656_v5 = vld [vmem:[#allocation27_spill] sm:$0xff] }
 0x6ab   :  { %1641 = vmatprep.subr.mxu0 %v2828_v18  ;;  %1712 = vmatprep.subr.mxu1 %v2831_v2  ;;  %v3657_v18 = vmov 0.0   ;;  %v3658_v2 = vld [vmem:[#allocation28_spill] sm:$0xff] }
 0x6ac   :  { %1642 = vmatpush1.msra.mxu0 %v2834_v13  ;;  %1713 = vmatpush1.msra.mxu1 %v2837_v10  ;;  %v3659_v13 = vld [vmem:[#allocation57_spill] sm:$0xff]  ;;  %v3660_v10 = vld [vmem:[#allocation7_spill] sm:$0xff] }
 0x6ad   :  { %1643 = vmatprep.subr.mxu0 %v2840_v7  ;;  %1714 = vmatprep.subr.mxu1 %v2843_v12  ;;  %v160_v7 = vmul.f32 %v3660_v10, %v3659_v13  ;;  %v3661_v12 = vld [vmem:[#allocation9_spill] sm:$0xff]  ;;  %v162_v30 = vmul.f32 %v2426_v4, %v3659_v13 }
 0x6ae   :  { %1644 = vmatpush1.msra.mxu0 %v2846_v16  ;;  %1715 = vmatpush1.msra.mxu1 %v2849_v15  ;;  %v3662_v15 = vld [vmem:[#allocation56_spill] sm:$0xff] }
 0x6af   :  { %1645 = vmatprep.subr.mxu0 %v2852_v9  ;;  %1716 = vmatprep.subr.mxu1 %v2855_v21  ;;  %v192_v16 = vadd.f32 %v160_v7, %v3661_v12  ;;  %v3663_v9 = vld [vmem:[#allocation8_spill] sm:$0xff]  ;;  %v280_v42 = vmul.f32 %v3515_v0, %v3662_v15  ;;  %v194_v38 = vadd.f32 %v162_v30, %v2444_v63 }
 0x6b0   :  { %1646 = vmatpush1.msra.mxu0 %v2858_v22  ;;  %1717 = vmatpush1.msra.mxu1 %v2861_v24  ;;  %v279_v21 = vmul.f32 %v3663_v9, %v3662_v15  ;;  %v3664_v24 = vld [vmem:[#allocation59_spill] sm:$0xff]  ;;  %v281_v40 = vmul.f32 %v2437_v8, %v3662_v15  ;;  %v1849_v9 = vld [vmem:[%s3236_s4] ss:$0 sm:$0xff] }
 0x6b1   :  { %1647 = vmatprep.subr.mxu0 %v2864_v25  ;;  %1718 = vmatprep.subr.mxu1 %v2867_v26 }
 0x6b2   :  { %1648 = vmatpush1.msra.mxu0 %v2870_v27  ;;  %1719 = vmatpush1.msra.mxu1 %v3569_v31  ;;  %v311_v26 = vadd.f32 %v279_v21, %v192_v16  ;;  %v3665_v27 = vld [vmem:[#allocation37_spill] sm:$0xff]  ;;  %v313_v46 = vadd.f32 %v281_v40, %v194_v38 }
 0x6b3   :  { %1649 = vmatprep.subr.mxu0 %v3570_v44  ;;  %1720 = vmatprep.subr.mxu1 %v3635_v35  ;;  %v161_v31 = vmul.f32 %v3665_v27, %v3659_v13 }
 0x6b4   :  { %1650 = vmatpush1.msra.mxu0 %v3636_v36  ;;  %1721 = vmatpush1.msra.mxu1 %v3637_v48 }
 0x6b5   :  { %1651 = vmatprep.subr.mxu0 %v3638_v3  ;;  %1722 = vmatprep.subr.mxu1 %v3639_v50  ;;  %v193_v45 = vadd.f32 %v161_v31, %v3480_v6 }
 0x6b6   :  { %1652 = vmatpush1.msra.mxu0 %v3640_v52  ;;  %1723 = vmatpush1.msra.mxu1 %v3641_v53 }
 0x6b7   :  { %1653 = vmatprep.subr.mxu0 %v3642_v55  ;;  %1724 = vmatprep.subr.mxu1 %v3643_v56  ;;  %v312_v39 = vadd.f32 %v280_v42, %v193_v45 }
 0x6b8   :  { %1654 = vmatpush1.msra.mxu0 %v3644_v58  ;;  %1725 = vmatpush1.msra.mxu1 %v3645_v59 }
 0x6b9   :  { %1655 = vmatprep.subr.mxu0 %v3646_v20  ;;  %1726 = vmatprep.subr.mxu1 %v3647_v23 }
 0x6ba   :  { %1656 = vmatpush1.msra.mxu0 %v3648_v1  ;;  %1727 = vmatpush1.msra.mxu1 %v3649_v61 }
 0x6bb   :  { %1657 = vmatprep.subr.mxu0 %v3650_v60  ;;  %1728 = vmatprep.subr.mxu1 %v3651_v14 }
 0x6bc   :  { %1658 = vmatpush1.msra.mxu0 %v3652_v17  ;;  %1729 = vmatpush1.msra.mxu1 %v3653_v19 }
 0x6bd   :  { %1659 = vmatprep.subr.mxu0 %v3654_v11  ;;  %1730 = vmatprep.subr.mxu1 %v3655_v62 }
 0x6be   :  { %1660 = vmatpush1.msra.mxu0 %v3656_v5  ;;  %1693 = vmatprep.mubr.f32.mxu0 %v3657_v18 }
 0x6bf   :  { %1731 = vmatpush1.msra.mxu1 %v3658_v2  ;;  %1764 = vmatprep.mubr.f32.mxu1 %v3657_v18 }
 0x75f   :  { %v1529_v22 = vpop.f32.mrf.mxu0  ;;  %v1600_v33 = vpop.f32.mrf.mxu1 }
 0x760   :  { %v1530_v25 = vadd.f32 %v1529_v22, %v3664_v24  ;;  %v1601_v37 = vadd.f32 %v1600_v33, %v312_v39 }
 0x761   :  { %v1531_v44 = vpop.f32.mrf.mxu0  ;;  %v1602_v51 = vpop.f32.mrf.mxu1 }
 0x762   :  { %v1843_v28 = vmul.f32 -1.442695, %v1530_v25  ;;  %v1532_v32 = vadd.f32 %v1531_v44, %v311_v26  ;;  %v1845_v47 = vmul.f32 -1.442695, %v1601_v37  ;;  %v1603_v6 = vadd.f32 %v1602_v51, %v313_v46 }
 0x764   :  { %1970 = vpow2.f32 %v1843_v28  ;;  %v1844_v41 = vmul.f32 -1.442695, %v1532_v32 }
 0x766   :  { %1972 = vpow2.f32 %v1844_v41 }
 0x767   :  { %1974 = vpow2.f32 %v1845_v47 }
 0x771   :  { %v1971_v34 = vpop.eup %1970 }
 0x772   :  { %v1614_v57 = vadd.f32 1.0, %v1971_v34 }
 0x773   :  { %v1973_v29 = vpop.eup %1972 }
 0x774   :  { %1976 = vrcp.f32 %v1614_v57  ;;  %v1615_v0 = vadd.f32 1.0, %v1973_v29  ;;  %v1975_v4 = vpop.eup %1974 }
 0x775   :  { %1978 = vtanh.f32 %v1603_v6  ;;  %v1616_v63 = vadd.f32 1.0, %v1975_v4 }
 0x776   :  { %1980 = vrcp.f32 %v1615_v0 }
 0x777   :  { %1982 = vrcp.f32 %v1616_v63 }
 0x781   :  { %v1977_v43 = vpop.eup %1976 }
 0x782   :  { %v1979_v49 = vpop.eup %1978 }
 0x783   :  { %v1981_v35 = vpop.eup %1980  ;;  %v1625_v8 = vmul.f32 %v1979_v49, %v1977_v43 }
 0x784   :  { %v1624_v36 = vmul.f32 %v1981_v35, %v3141_v54  ;;  %v1983_v3 = vpop.eup %1982 }
 0x786   :  { %v1626_v48 = vadd.f32 %v1625_v8, %v1624_v36 }
 0x788   :  { %1984 = vtanh.f32 %v1626_v48 }
 0x795   :  { %v1985_v50 = vpop.eup %1984 }
 0x796   :  { %v1628_v52 = vmul.f32 %v1985_v50, %v1983_v3 }
 0x798   :  { %1694 = vmatmul.mubr.f32.vlgmr.msra.gmra.mxu0 %v1628_v52  ;;  %1765 = vmatmul.mubr.f32.vlgmr.msra.gmra.mxu1 %v1628_v52 }
 0x858   :  { %v1695_v53 = vpop.f32.mrf.mxu0  ;;  %v1766_v23 = vpop.f32.mrf.mxu1 }
 0x859   :  { %v1696_v55 = vadd.f32 %v1695_v53, %v3664_v24  ;;  %v1767_v54 = vadd.f32 %v1766_v23, %v312_v39  ;;  %v1850_v24 = vld [vmem:[#allocation3] ss:$0 sm:$0xff] }
 0x85a   :  { %v1697_v56 = vpop.f32.mrf.mxu0  ;;  %v1768_v1 = vpop.f32.mrf.mxu1 }
 0x85b   :  { %v1846_v58 = vmul.f32 -1.442695, %v1696_v55  ;;  %v1698_v59 = vadd.f32 %v1697_v56, %v311_v26  ;;  %v1848_v61 = vmul.f32 -1.442695, %v1767_v54  ;;  %v1769_v14 = vadd.f32 %v1768_v1, %v313_v46 }
 0x85d   :  { %1986 = vpow2.f32 %v1846_v58  ;;  %v1847_v20 = vmul.f32 -1.442695, %v1698_v59 }
 0x85f   :  { %1988 = vpow2.f32 %v1847_v20 }
 0x860   :  { %1990 = vpow2.f32 %v1848_v61 }
 0x86a   :  { %v1987_v60 = vpop.eup %1986 }
 0x86b   :  { %v1780_v17 = vadd.f32 1.0, %v1987_v60 }
 0x86c   :  { %v1989_v19 = vpop.eup %1988 }
 0x86d   :  { %1992 = vrcp.f32 %v1780_v17  ;;  %v1781_v11 = vadd.f32 1.0, %v1989_v19  ;;  %v1991_v62 = vpop.eup %1990 }
 0x86e   :  { %1994 = vtanh.f32 %v1769_v14  ;;  %v1782_v13 = vadd.f32 1.0, %v1991_v62 }
 0x86f   :  { %1996 = vrcp.f32 %v1781_v11 }
 0x870   :  { %1998 = vrcp.f32 %v1782_v13 }
 0x87a   :  { %v1993_v5 = vpop.eup %1992 }
 0x87b   :  { %v1995_v18 = vpop.eup %1994 }
 0x87c   :  { %v1997_v2 = vpop.eup %1996  ;;  %v1791_v7 = vmul.f32 %v1995_v18, %v1993_v5 }
 0x87d   :  { %v1790_v10 = vmul.f32 %v1997_v2, %v1626_v48  ;;  %v1999_v16 = vpop.eup %1998 }
 0x87f   :  { %v1792_v12 = vadd.f32 %v1791_v7, %v1790_v10 }
 0x881   :  { %2000 = vtanh.f32 %v1792_v12 }
 0x88e   :  { %v2001_v15 = vpop.eup %2000 }
 0x88f   :  { %v1794_v21 = vmul.f32 %v2001_v15, %v1999_v16 }
 0x891   :  { %v1802_v22 = vmul.f32 %v1849_v9, %v1794_v21 }
 0x893   :  { %1803 = vadd.xlane.f32.xlu1 %v1802_v22 }
 0x91c   :  { %v1804_v25 = vpop.xlane.xlu1 %1803 }
 0x91d   :  { %v1812_v26 = vadd.f32 %v1850_v24, %v1804_v25 }
 0x91f   :  { %1814 = vst.msk [vmem:[%s3238_s6] sm:$0xff] %vm1813_vm1, %v1812_v26 }
 0x920   :  { %1819 = vsyncpa [#allocation5], 1 }

</bundles_post_ra>
